<compile_context>
chip_gen: v5e
topology: v5e:2x2
jax: 0.10.0
libtpu: 0.0.40
codegen_flags: <defaults>
</compile_context>

<pallas_src>
import numpy as np
import jax
import jax.numpy as jnp
from jax import lax
from jax.experimental import pallas as pl
from jax.experimental.pallas import tpu as pltpu


_SUBLANE_PAD = 16               # bf16 packed-tile sublane granularity (also multiple of 8)
_COMPUTE_DTYPE = jnp.bfloat16   # MXU operand dtype (accumulation stays f32)


def _round_up(x, m):
    return (x + m - 1) // m * m


def _vmem_capacity_bytes():
    try:
        return int(pltpu.get_tpu_info().vmem_capacity_bytes)
    except Exception:
        return 64 * 1024 * 1024   # conservative default (v7x per-TensorCore VMEM)


def _layer_metadata(F0, conv_ws, split_half):
    """Static per-layer dims, zero-padded to _SUBLANE_PAD so every slab is tile-aligned."""
    num_layers = len(conv_ws)
    metas, Fn, int_off = [], F0, 0
    for i, w in enumerate(conv_ws):
        L = int(w.shape[0])
        assert w.shape[1] == F0 * Fn, (w.shape, F0, Fn)
        split = split_half and i != num_layers - 1
        if split:
            assert L % 2 == 0, "split_half requires even cross layer sizes"
        keep = L // 2 if split else L
        Fn_pad = _round_up(Fn, _SUBLANE_PAD)
        keep_pad = _round_up(keep, _SUBLANE_PAD)
        xs_rows = L - keep if split else 0
        xs_pad = _round_up(xs_rows, _SUBLANE_PAD) if split else 0
        metas.append(dict(
            Fn=Fn, Fn_pad=Fn_pad, K=F0 * Fn_pad, L=L, keep=keep, keep_pad=keep_pad,
            xs_rows=xs_rows, xs_pad=xs_pad, split=split,
            Lp=keep_pad + xs_pad, int_off=int_off))
        int_off += keep_pad
        Fn = xs_rows if split else L
    return metas, int_off          # int_off == sum(keep_pad) == padded fc input rows


def _pack_params(metas, conv_ws, conv_bs, fc_w, F0, sum_keep_pad):
    """Repack conv/fc params to the padded, (keep | xs)-blocked row layout (bf16)."""
    w_packed, b_packed = [], []
    for m, w, b in zip(metas, conv_ws, conv_bs):
        Fn, Fn_pad, L, keep = m["Fn"], m["Fn_pad"], m["L"], m["keep"]
        keep_pad, Lp, K, split = m["keep_pad"], m["Lp"], m["K"], m["split"]
        # zero-pad the xs (j) axis of the contraction: (L, F0*Fn) -> (L, F0*Fn_pad)
        wc = jnp.pad(w.reshape(L, F0, Fn),
                     ((0, 0), (0, 0), (0, Fn_pad - Fn))).reshape(L, K)
        wp = jnp.zeros((Lp, K), w.dtype).at[:keep].set(wc[:keep])
        bp = jnp.zeros((Lp, 1), jnp.float32).at[:keep].set(b[:keep].reshape(keep, 1))
        if split:
            wp = wp.at[keep_pad:keep_pad + (L - keep)].set(wc[keep:])
            bp = bp.at[keep_pad:keep_pad + (L - keep)].set(b[keep:].reshape(L - keep, 1))
        w_packed.append(wp.astype(_COMPUTE_DTYPE))
        b_packed.append(bp)
    # fc weight -> one (1, sum_keep_pad) row (zeros in padded columns): single fc matmul
    fc_row = jnp.zeros((1, sum_keep_pad), jnp.float32)
    off = 0
    for m in metas:
        fc_row = fc_row.at[0, m["int_off"]:m["int_off"] + m["keep"]].set(
            fc_w[off:off + m["keep"], 0])
        off += m["keep"]
    assert off == fc_w.shape[0]
    return w_packed, b_packed, fc_row.astype(_COMPUTE_DTYPE)


def _pick_batch_tile(B, E, max_lanes):
    """Divisor Bt of B with Bt*E <= max_lanes and lane-aligned blocks (or full array)."""
    cands = []
    for bt in range(1, B + 1):
        if B % bt:
            continue
        lanes = bt * E
        if lanes > max_lanes:
            continue
        if bt != B and lanes % 128 != 0:
            continue                      # tiled lane blocks must stay 128-aligned
        cands.append(bt)
    if not cands:
        # Nothing lane-aligned fits the budget: take the SMALLEST aligned divisor
        # (minimal overshoot) instead of silently falling back to Bt=B.
        aligned = [bt for bt in range(1, B + 1)
                   if B % bt == 0 and (bt == B or (bt * E) % 128 == 0)]
        return min(aligned, key=lambda bt: bt * E)
    multi = [bt for bt in cands if B // bt >= 2]   # >=2 grid steps -> both v7x TCs
    return max(multi) if multi else max(cands)


def _make_cin_kernel(metas, F0, Bt, E):
    num_layers = len(metas)
    N = Bt * E

    def kernel(*refs):
        x_ref = refs[0]
        w_refs = refs[1:1 + num_layers]                       # (Lp_i, K_i) bf16
        b_refs = refs[1 + num_layers:1 + 2 * num_layers]      # (Lp_i, 1)  f32
        fc_ref = refs[1 + 2 * num_layers]                     # (1, sum_keep_pad) bf16
        fcb_ref = refs[2 + 2 * num_layers]                    # (1, 1) f32
        out_ref = refs[3 + 2 * num_layers]                    # (1, 1, Bt)
        xi_scr, xs_scr, int_scr = refs[4 + 2 * num_layers:7 + 2 * num_layers]

        # xs for layer 0 is x itself: read straight from the (f32) input ref.
        xs_ref, xs_off = x_ref, 0

        for i, m in enumerate(metas):
            Fn_pad, K, keep_pad, xs_pad, split, off = (
                m["Fn_pad"], m["K"], m["keep_pad"], m["xs_pad"], m["split"], m["int_off"])
            # Interaction slab fill: xi[r*Fn_pad + j, :] = x0[r, :] * xs[j, :].
            # Reads/writes stay inside the loop (no (F0, N) value live across the layer);
            # product is f32 on the VPU, cast to bf16 at the tile-aligned store.
            for r in range(F0):
                slab = x_ref[r:r + 1, :] * xs_ref[xs_off:xs_off + Fn_pad, :]
                xi_scr[r * Fn_pad:(r + 1) * Fn_pad, :] = slab.astype(xi_scr.dtype)
            # 1x1 conv == ONE bf16 MXU matmul over the full K = F0*Fn_pad contraction.
            conv = jnp.dot(w_refs[i][...], xi_scr[0:K, :],
                           preferred_element_type=jnp.float32)          # (Lp, N) f32
            conv = jnp.maximum(conv + b_refs[i][...], 0.0)              # bias + ReLU
            # x_int slab -> interactions scratch (consumed by ONE fused fc matmul below).
            int_scr[off:off + keep_pad, :] = conv[0:keep_pad, :].astype(int_scr.dtype)
            if split:
                xs_scr[0:xs_pad, :] = conv[keep_pad:keep_pad + xs_pad, :].astype(xs_scr.dtype)
                xs_ref, xs_off = xs_scr, 0
            else:
                xs_ref, xs_off = int_scr, off   # x == x_interaction when not splitting

        # fc head over the concatenated (padded) interactions: a single MXU push.
        acc = jnp.dot(fc_ref[...], int_scr[...],
                      preferred_element_type=jnp.float32)               # (1, N) f32
        # Sum over the embed dim per batch slot as an MXU contraction with an in-kernel
        # one-hot (iota + compare: no HBM DMA, no XLU cross-lane reduce, no int division).
        n_ids = lax.broadcasted_iota(jnp.int32, (N, Bt), 0)
        b_ids = lax.broadcasted_iota(jnp.int32, (N, Bt), 1) * E
        pool = ((n_ids >= b_ids) & (n_ids < b_ids + E)).astype(jnp.float32)
        pooled = jnp.dot(acc, pool, preferred_element_type=jnp.float32) + fcb_ref[...]
        out_ref[0] = pooled.astype(out_ref.dtype)

    return kernel


def cin_forward(x, conv_ws, conv_bs, fc_w, fc_b, split_half=True):
    """x: (B, F0, E); conv_ws[i]: (L_i, F0*Fn_i); conv_bs[i]: (L_i, 1);
    fc_w: (fc_input_dim, 1); fc_b: (1, 1)  ->  (B, 1)."""
    B, F0, E = x.shape

    metas, sum_keep_pad = _layer_metadata(F0, conv_ws, split_half)
    w_packed, b_packed, fc_row = _pack_params(metas, conv_ws, conv_bs, fc_w, F0, sum_keep_pad)

    F0_pad = metas[0]["Fn_pad"]                  # layer-0 xs is x itself
    K_max = max(m["K"] for m in metas)
    Lp_max = max(m["Lp"] for m in metas)
    xs_pad_max = max(max((m["xs_pad"] for m in metas if m["split"]), default=0),
                     _SUBLANE_PAD)

    # --- generation-aware batch-tile sizing (v5e/v6e: 128 MiB, v7x: 64 MiB VMEM) ------
    vmem_cap = _vmem_capacity_bytes()
    isz = jnp.dtype(_COMPUTE_DTYPE).itemsize
    bytes_per_lane = (2 * 4 * F0_pad             # x block (f32, double-buffered)
                      + isz * K_max              # interaction scratch (bf16)
                      + isz * xs_pad_max         # xs carry scratch (bf16)
                      + isz * sum_keep_pad       # interactions (fc input) scratch (bf16)
                      + 4 * Lp_max)              # in-flight conv tile (f32)
    const_bytes = sum(int(np.prod(w.shape)) * isz for w in w_packed)
    const_bytes += sum(int(np.prod(b.shape)) * 4 for b in b_packed) + sum_keep_pad * isz
    const_bytes *= 2                             # worst case: still double-buffered
    budget = vmem_cap // 2 - const_bytes         # keep half of VMEM as compiler headroom
    max_lanes = min(8192, max(128, (budget // bytes_per_lane) // 128 * 128))
    Bt = _pick_batch_tile(B, E, max_lanes)
    assert B % Bt == 0
    n_tiles = B // Bt
    N = Bt * E

    # Pack batch into lanes: (B, F0, E) -> (F0_pad, B*E), lane index = b*E + e.
    x_packed = jnp.transpose(x, (1, 0, 2)).reshape(F0, B * E)
    x_packed = jnp.pad(x_packed, ((0, F0_pad - F0), (0, 0)))

    kernel = _make_cin_kernel(metas, F0, Bt, E)
    out_shape = jax.ShapeDtypeStruct((n_tiles, 1, Bt), x.dtype)
    scratch_shapes = [pltpu.VMEM((K_max, N), _COMPUTE_DTYPE),          # xi (interaction)
                      pltpu.VMEM((xs_pad_max, N), _COMPUTE_DTYPE),     # xs carry
                      pltpu.VMEM((sum_keep_pad, N), _COMPUTE_DTYPE)]   # concat interactions
    compiler_params = pltpu.CompilerParams(
        dimension_semantics=("parallel",),
        vmem_limit_bytes=int(min(vmem_cap * 0.85, 127 * 1024 * 1024)))

    def run(single_buffer_consts):
        def const_spec(shape):
            idx = lambda i: (0,) * len(shape)
            if single_buffer_consts:
                return pl.BlockSpec(shape, idx, pipeline_mode=pl.Buffered(1))
            return pl.BlockSpec(shape, idx)

        in_specs = [pl.BlockSpec((F0_pad, N), lambda i: (0, i))]       # batch-tile lanes
        in_specs += [const_spec(w.shape) for w in w_packed]
        in_specs += [const_spec(b.shape) for b in b_packed]
        in_specs += [const_spec(fc_row.shape), const_spec((1, 1))]

        return pl.pallas_call(
            kernel,
            out_shape=out_shape,
            grid=(n_tiles,),
            in_specs=in_specs,
            out_specs=pl.BlockSpec((1, 1, Bt), lambda i: (i, 0, 0)),
            scratch_shapes=scratch_shapes,
            compiler_params=compiler_params,
        )(x_packed, *w_packed, *b_packed, fc_row, fc_b.reshape(1, 1).astype(jnp.float32))

    try:
        out = run(single_buffer_consts=True)
    except Exception:
        # Fallback if this jax build rejects pl.Buffered(1) on top-level pallas_call
        # inputs: default double buffering for the constant-index weights.
        out = run(single_buffer_consts=False)

    return out.reshape(B, 1)


# ---------------------------------------------------------------------------
# Pure-JAX reference (matches the PyTorch forward semantics exactly, f32)
# ---------------------------------------------------------------------------
def cin_reference(x, conv_ws, conv_bs, fc_w, fc_b, split_half=True):
    B, F0, E = x.shape
    num_layers = len(conv_ws)
    x0 = x
    xs = x
    interactions = []
    for i in range(num_layers):
        xi = x0[:, :, None, :] * xs[:, None, :, :]               # (B, F0, Fn, E)
        xi = xi.reshape(B, -1, E)
        out = jnp.einsum("lc,bce->ble", conv_ws[i], xi) + conv_bs[i][None, :, :]
        out = jnp.maximum(out, 0.0)
        L = out.shape[1]
        if split_half and i != num_layers - 1:
            half = L // 2
            x_int, xs = out[:, :half, :], out[:, half:, :]
        else:
            x_int = out
            xs = out
        interactions.append(x_int)
    pooled = jnp.sum(jnp.concatenate(interactions, axis=1), axis=2)
    return pooled @ fc_w + fc_b


# ---------------------------------------------------------------------------
# Deterministic parameter construction (mirrors the module's __init__ shapes)
# ---------------------------------------------------------------------------
def build_params(key, input_dim, cross_layer_sizes, split_half=True):
    num_layers = len(cross_layer_sizes)
    conv_ws, conv_bs = [], []
    prev_input_dim, fc_input_dim = input_dim, 0
    for i, layer_size in enumerate(cross_layer_sizes):
        in_ch = input_dim * prev_input_dim
        key, kw, kb = jax.random.split(key, 3)
        bound = 1.0 / np.sqrt(in_ch)
        # Conv1d(in_ch, layer_size, kernel_size=1) weight squeezed to (layer_size, in_ch)
        w = jax.random.uniform(kw, (layer_size, in_ch), jnp.float32, -bound, bound)
        b = jax.random.uniform(kb, (layer_size, 1), jnp.float32, -bound, bound)
        conv_ws.append(w)
        conv_bs.append(b)
        if split_half and i != num_layers - 1:
            layer_size //= 2
        prev_input_dim = layer_size
        fc_input_dim += prev_input_dim
    key, kw, kb = jax.random.split(key, 3)
    bound = 1.0 / np.sqrt(fc_input_dim)
    fc_w = jax.random.uniform(kw, (fc_input_dim, 1), jnp.float32, -bound, bound)
    fc_b = jax.random.uniform(kb, (1, 1), jnp.float32, -bound, bound)
    return conv_ws, conv_bs, fc_w, fc_b


if __name__ == "__main__":
    # Small shapes: batch=2, num_fields (input_dim)=4, embed_dim=16
    B, NUM_FIELDS, EMBED_DIM = 2, 4, 16
    CROSS_LAYER_SIZES = [8, 6, 4]
    SPLIT_HALF = True

    key = jax.random.PRNGKey(0)
    key, kx, kp = jax.random.split(key, 3)
    x = jax.random.normal(kx, (B, NUM_FIELDS, EMBED_DIM), jnp.float32)
    conv_ws, conv_bs, fc_w, fc_b = build_params(
        kp, NUM_FIELDS, CROSS_LAYER_SIZES, SPLIT_HALF)

    out = jax.block_until_ready(cin_forward(x, conv_ws, conv_bs, fc_w, fc_b, SPLIT_HALF))
    ref = jax.block_until_ready(cin_reference(x, conv_ws, conv_bs, fc_w, fc_b, SPLIT_HALF))

    assert out.shape == (B, 1), out.shape
    # bf16 MXU operands with f32 accumulation: tolerance loosened vs the old f32 kernel.
    np.testing.assert_allclose(np.asarray(out), np.asarray(ref), rtol=3e-2, atol=3e-2)
    print("KERNEL_OK")
</pallas_src>

<mosaic_0001>
module attributes {stable_mosaic.version = 11 : i64} {
  func.func @kernel(%arg0: i32, %arg1: memref<16x32xf32, #tpu.memory_space<vmem>>, %arg2: memref<32x64xbf16, #tpu.memory_space<vmem>>, %arg3: memref<32x64xbf16, #tpu.memory_space<vmem>>, %arg4: memref<16x64xbf16, #tpu.memory_space<vmem>>, %arg5: memref<32x1xf32, #tpu.memory_space<vmem>>, %arg6: memref<32x1xf32, #tpu.memory_space<vmem>>, %arg7: memref<16x1xf32, #tpu.memory_space<vmem>>, %arg8: memref<1x48xbf16, #tpu.memory_space<vmem>>, %arg9: memref<1x1xf32, #tpu.memory_space<vmem>>, %arg10: memref<1x1x2xf32, #tpu.memory_space<vmem>>, %arg11: memref<64x32xbf16, #tpu.memory_space<vmem>>, %arg12: memref<16x32xbf16, #tpu.memory_space<vmem>>, %arg13: memref<48x32xbf16, #tpu.memory_space<vmem>>) attributes {dimension_semantics = [#tpu.dimension_semantics<parallel>], iteration_bounds = array<i64: 1>, scalar_prefetch = 0 : i64, scratch_operands = 3 : i64, tpu.core_type = #tpu.core_type<tc>, window_params = [{transform_indices = @transform_0, window_bounds = array<i64: 16, 32>}, {pipeline_mode = #tpu.pipeline_mode<synchronous>, transform_indices = @transform_1, window_bounds = array<i64: 32, 64>}, {pipeline_mode = #tpu.pipeline_mode<synchronous>, transform_indices = @transform_2, window_bounds = array<i64: 32, 64>}, {pipeline_mode = #tpu.pipeline_mode<synchronous>, transform_indices = @transform_3, window_bounds = array<i64: 16, 64>}, {pipeline_mode = #tpu.pipeline_mode<synchronous>, transform_indices = @transform_4, window_bounds = array<i64: 32, 1>}, {pipeline_mode = #tpu.pipeline_mode<synchronous>, transform_indices = @transform_5, window_bounds = array<i64: 32, 1>}, {pipeline_mode = #tpu.pipeline_mode<synchronous>, transform_indices = @transform_6, window_bounds = array<i64: 16, 1>}, {pipeline_mode = #tpu.pipeline_mode<synchronous>, transform_indices = @transform_7, window_bounds = array<i64: 1, 48>}, {pipeline_mode = #tpu.pipeline_mode<synchronous>, transform_indices = @transform_8, window_bounds = array<i64: 1, 1>}, {transform_indices = @transform_9, window_bounds = array<i64: 1, 1, 2>}]} {
    %c0 = arith.constant 0 : index
    %c0_0 = arith.constant 0 : index
    %0 = vector.load %arg1[%c0, %c0_0] : memref<16x32xf32, #tpu.memory_space<vmem>>, vector<1x32xf32>
    %c0_1 = arith.constant 0 : index
    %c0_2 = arith.constant 0 : index
    %1 = vector.load %arg1[%c0_1, %c0_2] : memref<16x32xf32, #tpu.memory_space<vmem>>, vector<16x32xf32>
    %2 = vector.broadcast %0 : vector<1x32xf32> to vector<16x32xf32>
    %3 = arith.mulf %2, %1 : vector<16x32xf32>
    %4 = arith.truncf %3 : vector<16x32xf32> to vector<16x32xbf16>
    %c0_3 = arith.constant 0 : index
    %c0_4 = arith.constant 0 : index
    %5 = vector.load %arg11[%c0_3, %c0_4] : memref<64x32xbf16, #tpu.memory_space<vmem>>, vector<16x32xbf16>
    tpu.vector_store %arg11[%c0_3, %c0_4], %4 {strides = array<i32>} : memref<64x32xbf16, #tpu.memory_space<vmem>>, vector<16x32xbf16>,
    %c1 = arith.constant 1 : index
    %c0_5 = arith.constant 0 : index
    %6 = vector.load %arg1[%c1, %c0_5] : memref<16x32xf32, #tpu.memory_space<vmem>>, vector<1x32xf32>
    %c0_6 = arith.constant 0 : index
    %c0_7 = arith.constant 0 : index
    %7 = vector.load %arg1[%c0_6, %c0_7] : memref<16x32xf32, #tpu.memory_space<vmem>>, vector<16x32xf32>
    %8 = vector.broadcast %6 : vector<1x32xf32> to vector<16x32xf32>
    %9 = arith.mulf %8, %7 : vector<16x32xf32>
    %10 = arith.truncf %9 : vector<16x32xf32> to vector<16x32xbf16>
    %c16 = arith.constant 16 : index
    %c0_8 = arith.constant 0 : index
    %11 = vector.load %arg11[%c16, %c0_8] : memref<64x32xbf16, #tpu.memory_space<vmem>>, vector<16x32xbf16>
    tpu.vector_store %arg11[%c16, %c0_8], %10 {strides = array<i32>} : memref<64x32xbf16, #tpu.memory_space<vmem>>, vector<16x32xbf16>,
    %c2 = arith.constant 2 : index
    %c0_9 = arith.constant 0 : index
    %12 = vector.load %arg1[%c2, %c0_9] : memref<16x32xf32, #tpu.memory_space<vmem>>, vector<1x32xf32>
    %c0_10 = arith.constant 0 : index
    %c0_11 = arith.constant 0 : index
    %13 = vector.load %arg1[%c0_10, %c0_11] : memref<16x32xf32, #tpu.memory_space<vmem>>, vector<16x32xf32>
    %14 = vector.broadcast %12 : vector<1x32xf32> to vector<16x32xf32>
    %15 = arith.mulf %14, %13 : vector<16x32xf32>
    %16 = arith.truncf %15 : vector<16x32xf32> to vector<16x32xbf16>
    %c32 = arith.constant 32 : index
    %c0_12 = arith.constant 0 : index
    %17 = vector.load %arg11[%c32, %c0_12] : memref<64x32xbf16, #tpu.memory_space<vmem>>, vector<16x32xbf16>
    tpu.vector_store %arg11[%c32, %c0_12], %16 {strides = array<i32>} : memref<64x32xbf16, #tpu.memory_space<vmem>>, vector<16x32xbf16>,
    %c3 = arith.constant 3 : index
    %c0_13 = arith.constant 0 : index
    %18 = vector.load %arg1[%c3, %c0_13] : memref<16x32xf32, #tpu.memory_space<vmem>>, vector<1x32xf32>
    %c0_14 = arith.constant 0 : index
    %c0_15 = arith.constant 0 : index
    %19 = vector.load %arg1[%c0_14, %c0_15] : memref<16x32xf32, #tpu.memory_space<vmem>>, vector<16x32xf32>
    %20 = vector.broadcast %18 : vector<1x32xf32> to vector<16x32xf32>
    %21 = arith.mulf %20, %19 : vector<16x32xf32>
    %22 = arith.truncf %21 : vector<16x32xf32> to vector<16x32xbf16>
    %c48 = arith.constant 48 : index
    %c0_16 = arith.constant 0 : index
    %23 = vector.load %arg11[%c48, %c0_16] : memref<64x32xbf16, #tpu.memory_space<vmem>>, vector<16x32xbf16>
    tpu.vector_store %arg11[%c48, %c0_16], %22 {strides = array<i32>} : memref<64x32xbf16, #tpu.memory_space<vmem>>, vector<16x32xbf16>,
    %c0_17 = arith.constant 0 : index
    %c0_18 = arith.constant 0 : index
    %24 = vector.load %arg2[%c0_17, %c0_18] : memref<32x64xbf16, #tpu.memory_space<vmem>>, vector<32x64xbf16>
    %c0_19 = arith.constant 0 : index
    %c0_20 = arith.constant 0 : index
    %25 = vector.load %arg11[%c0_19, %c0_20] : memref<64x32xbf16, #tpu.memory_space<vmem>>, vector<64x32xbf16>
    %cst = arith.constant dense<0.000000e+00> : vector<32x32xf32>
    %26 = tpu.matmul %24, %25, %cst {dimension_numbers = #tpu.dot_dimension_numbers<[1], [0], [0], [1], [0, 0, 1, 1], [], []>} : vector<32x64xbf16>, vector<64x32xbf16>, vector<32x32xf32> -> vector<32x32xf32>
    %c0_21 = arith.constant 0 : index
    %c0_22 = arith.constant 0 : index
    %27 = vector.load %arg5[%c0_21, %c0_22] : memref<32x1xf32, #tpu.memory_space<vmem>>, vector<32x1xf32>
    %28 = vector.broadcast %27 : vector<32x1xf32> to vector<32x32xf32>
    %29 = arith.addf %26, %28 : vector<32x32xf32>
    %cst_23 = arith.constant 0.000000e+00 : f32
    %30 = vector.broadcast %cst_23 : f32 to vector<32x32xf32>
    %31 = arith.maximumf %29, %30 : vector<32x32xf32>
    %32 = vector.extract_strided_slice %31 {offsets = [0, 0], sizes = [16, 32], strides = [1, 1]} : vector<32x32xf32> to vector<16x32xf32>
    %33 = arith.truncf %32 : vector<16x32xf32> to vector<16x32xbf16>
    %c0_24 = arith.constant 0 : index
    %c0_25 = arith.constant 0 : index
    %34 = vector.load %arg13[%c0_24, %c0_25] : memref<48x32xbf16, #tpu.memory_space<vmem>>, vector<16x32xbf16>
    tpu.vector_store %arg13[%c0_24, %c0_25], %33 {strides = array<i32>} : memref<48x32xbf16, #tpu.memory_space<vmem>>, vector<16x32xbf16>,
    %35 = vector.extract_strided_slice %31 {offsets = [16, 0], sizes = [16, 32], strides = [1, 1]} : vector<32x32xf32> to vector<16x32xf32>
    %36 = arith.truncf %35 : vector<16x32xf32> to vector<16x32xbf16>
    %c0_26 = arith.constant 0 : index
    %c0_27 = arith.constant 0 : index
    %37 = vector.load %arg12[%c0_26, %c0_27] : memref<16x32xbf16, #tpu.memory_space<vmem>>, vector<16x32xbf16>
    tpu.vector_store %arg12[%c0_26, %c0_27], %36 {strides = array<i32>} : memref<16x32xbf16, #tpu.memory_space<vmem>>, vector<16x32xbf16>,
    %c0_28 = arith.constant 0 : index
    %c0_29 = arith.constant 0 : index
    %38 = vector.load %arg1[%c0_28, %c0_29] : memref<16x32xf32, #tpu.memory_space<vmem>>, vector<1x32xf32>
    %c0_30 = arith.constant 0 : index
    %c0_31 = arith.constant 0 : index
    %39 = vector.load %arg12[%c0_30, %c0_31] : memref<16x32xbf16, #tpu.memory_space<vmem>>, vector<16x32xbf16>
    %40 = arith.extf %39 : vector<16x32xbf16> to vector<16x32xf32>
    %41 = vector.broadcast %38 : vector<1x32xf32> to vector<16x32xf32>
    %42 = arith.mulf %41, %40 : vector<16x32xf32>
    %43 = arith.truncf %42 : vector<16x32xf32> to vector<16x32xbf16>
    %c0_32 = arith.constant 0 : index
    %c0_33 = arith.constant 0 : index
    %44 = vector.load %arg11[%c0_32, %c0_33] : memref<64x32xbf16, #tpu.memory_space<vmem>>, vector<16x32xbf16>
    tpu.vector_store %arg11[%c0_32, %c0_33], %43 {strides = array<i32>} : memref<64x32xbf16, #tpu.memory_space<vmem>>, vector<16x32xbf16>,
    %c1_34 = arith.constant 1 : index
    %c0_35 = arith.constant 0 : index
    %45 = vector.load %arg1[%c1_34, %c0_35] : memref<16x32xf32, #tpu.memory_space<vmem>>, vector<1x32xf32>
    %c0_36 = arith.constant 0 : index
    %c0_37 = arith.constant 0 : index
    %46 = vector.load %arg12[%c0_36, %c0_37] : memref<16x32xbf16, #tpu.memory_space<vmem>>, vector<16x32xbf16>
    %47 = arith.extf %46 : vector<16x32xbf16> to vector<16x32xf32>
    %48 = vector.broadcast %45 : vector<1x32xf32> to vector<16x32xf32>
    %49 = arith.mulf %48, %47 : vector<16x32xf32>
    %50 = arith.truncf %49 : vector<16x32xf32> to vector<16x32xbf16>
    %c16_38 = arith.constant 16 : index
    %c0_39 = arith.constant 0 : index
    %51 = vector.load %arg11[%c16_38, %c0_39] : memref<64x32xbf16, #tpu.memory_space<vmem>>, vector<16x32xbf16>
    tpu.vector_store %arg11[%c16_38, %c0_39], %50 {strides = array<i32>} : memref<64x32xbf16, #tpu.memory_space<vmem>>, vector<16x32xbf16>,
    %c2_40 = arith.constant 2 : index
    %c0_41 = arith.constant 0 : index
    %52 = vector.load %arg1[%c2_40, %c0_41] : memref<16x32xf32, #tpu.memory_space<vmem>>, vector<1x32xf32>
    %c0_42 = arith.constant 0 : index
    %c0_43 = arith.constant 0 : index
    %53 = vector.load %arg12[%c0_42, %c0_43] : memref<16x32xbf16, #tpu.memory_space<vmem>>, vector<16x32xbf16>
    %54 = arith.extf %53 : vector<16x32xbf16> to vector<16x32xf32>
    %55 = vector.broadcast %52 : vector<1x32xf32> to vector<16x32xf32>
    %56 = arith.mulf %55, %54 : vector<16x32xf32>
    %57 = arith.truncf %56 : vector<16x32xf32> to vector<16x32xbf16>
    %c32_44 = arith.constant 32 : index
    %c0_45 = arith.constant 0 : index
    %58 = vector.load %arg11[%c32_44, %c0_45] : memref<64x32xbf16, #tpu.memory_space<vmem>>, vector<16x32xbf16>
    tpu.vector_store %arg11[%c32_44, %c0_45], %57 {strides = array<i32>} : memref<64x32xbf16, #tpu.memory_space<vmem>>, vector<16x32xbf16>,
    %c3_46 = arith.constant 3 : index
    %c0_47 = arith.constant 0 : index
    %59 = vector.load %arg1[%c3_46, %c0_47] : memref<16x32xf32, #tpu.memory_space<vmem>>, vector<1x32xf32>
    %c0_48 = arith.constant 0 : index
    %c0_49 = arith.constant 0 : index
    %60 = vector.load %arg12[%c0_48, %c0_49] : memref<16x32xbf16, #tpu.memory_space<vmem>>, vector<16x32xbf16>
    %61 = arith.extf %60 : vector<16x32xbf16> to vector<16x32xf32>
    %62 = vector.broadcast %59 : vector<1x32xf32> to vector<16x32xf32>
    %63 = arith.mulf %62, %61 : vector<16x32xf32>
    %64 = arith.truncf %63 : vector<16x32xf32> to vector<16x32xbf16>
    %c48_50 = arith.constant 48 : index
    %c0_51 = arith.constant 0 : index
    %65 = vector.load %arg11[%c48_50, %c0_51] : memref<64x32xbf16, #tpu.memory_space<vmem>>, vector<16x32xbf16>
    tpu.vector_store %arg11[%c48_50, %c0_51], %64 {strides = array<i32>} : memref<64x32xbf16, #tpu.memory_space<vmem>>, vector<16x32xbf16>,
    %c0_52 = arith.constant 0 : index
    %c0_53 = arith.constant 0 : index
    %66 = vector.load %arg3[%c0_52, %c0_53] : memref<32x64xbf16, #tpu.memory_space<vmem>>, vector<32x64xbf16>
    %c0_54 = arith.constant 0 : index
    %c0_55 = arith.constant 0 : index
    %67 = vector.load %arg11[%c0_54, %c0_55] : memref<64x32xbf16, #tpu.memory_space<vmem>>, vector<64x32xbf16>
    %cst_56 = arith.constant dense<0.000000e+00> : vector<32x32xf32>
    %68 = tpu.matmul %66, %67, %cst_56 {dimension_numbers = #tpu.dot_dimension_numbers<[1], [0], [0], [1], [0, 0, 1, 1], [], []>} : vector<32x64xbf16>, vector<64x32xbf16>, vector<32x32xf32> -> vector<32x32xf32>
    %c0_57 = arith.constant 0 : index
    %c0_58 = arith.constant 0 : index
    %69 = vector.load %arg6[%c0_57, %c0_58] : memref<32x1xf32, #tpu.memory_space<vmem>>, vector<32x1xf32>
    %70 = vector.broadcast %69 : vector<32x1xf32> to vector<32x32xf32>
    %71 = arith.addf %68, %70 : vector<32x32xf32>
    %cst_59 = arith.constant 0.000000e+00 : f32
    %72 = vector.broadcast %cst_59 : f32 to vector<32x32xf32>
    %73 = arith.maximumf %71, %72 : vector<32x32xf32>
    %74 = vector.extract_strided_slice %73 {offsets = [0, 0], sizes = [16, 32], strides = [1, 1]} : vector<32x32xf32> to vector<16x32xf32>
    %75 = arith.truncf %74 : vector<16x32xf32> to vector<16x32xbf16>
    %c16_60 = arith.constant 16 : index
    %c0_61 = arith.constant 0 : index
    %76 = vector.load %arg13[%c16_60, %c0_61] : memref<48x32xbf16, #tpu.memory_space<vmem>>, vector<16x32xbf16>
    tpu.vector_store %arg13[%c16_60, %c0_61], %75 {strides = array<i32>} : memref<48x32xbf16, #tpu.memory_space<vmem>>, vector<16x32xbf16>,
    %77 = vector.extract_strided_slice %73 {offsets = [16, 0], sizes = [16, 32], strides = [1, 1]} : vector<32x32xf32> to vector<16x32xf32>
    %78 = arith.truncf %77 : vector<16x32xf32> to vector<16x32xbf16>
    %c0_62 = arith.constant 0 : index
    %c0_63 = arith.constant 0 : index
    %79 = vector.load %arg12[%c0_62, %c0_63] : memref<16x32xbf16, #tpu.memory_space<vmem>>, vector<16x32xbf16>
    tpu.vector_store %arg12[%c0_62, %c0_63], %78 {strides = array<i32>} : memref<16x32xbf16, #tpu.memory_space<vmem>>, vector<16x32xbf16>,
    %c0_64 = arith.constant 0 : index
    %c0_65 = arith.constant 0 : index
    %80 = vector.load %arg1[%c0_64, %c0_65] : memref<16x32xf32, #tpu.memory_space<vmem>>, vector<1x32xf32>
    %c0_66 = arith.constant 0 : index
    %c0_67 = arith.constant 0 : index
    %81 = vector.load %arg12[%c0_66, %c0_67] : memref<16x32xbf16, #tpu.memory_space<vmem>>, vector<16x32xbf16>
    %82 = arith.extf %81 : vector<16x32xbf16> to vector<16x32xf32>
    %83 = vector.broadcast %80 : vector<1x32xf32> to vector<16x32xf32>
    %84 = arith.mulf %83, %82 : vector<16x32xf32>
    %85 = arith.truncf %84 : vector<16x32xf32> to vector<16x32xbf16>
    %c0_68 = arith.constant 0 : index
    %c0_69 = arith.constant 0 : index
    %86 = vector.load %arg11[%c0_68, %c0_69] : memref<64x32xbf16, #tpu.memory_space<vmem>>, vector<16x32xbf16>
    tpu.vector_store %arg11[%c0_68, %c0_69], %85 {strides = array<i32>} : memref<64x32xbf16, #tpu.memory_space<vmem>>, vector<16x32xbf16>,
    %c1_70 = arith.constant 1 : index
    %c0_71 = arith.constant 0 : index
    %87 = vector.load %arg1[%c1_70, %c0_71] : memref<16x32xf32, #tpu.memory_space<vmem>>, vector<1x32xf32>
    %c0_72 = arith.constant 0 : index
    %c0_73 = arith.constant 0 : index
    %88 = vector.load %arg12[%c0_72, %c0_73] : memref<16x32xbf16, #tpu.memory_space<vmem>>, vector<16x32xbf16>
    %89 = arith.extf %88 : vector<16x32xbf16> to vector<16x32xf32>
    %90 = vector.broadcast %87 : vector<1x32xf32> to vector<16x32xf32>
    %91 = arith.mulf %90, %89 : vector<16x32xf32>
    %92 = arith.truncf %91 : vector<16x32xf32> to vector<16x32xbf16>
    %c16_74 = arith.constant 16 : index
    %c0_75 = arith.constant 0 : index
    %93 = vector.load %arg11[%c16_74, %c0_75] : memref<64x32xbf16, #tpu.memory_space<vmem>>, vector<16x32xbf16>
    tpu.vector_store %arg11[%c16_74, %c0_75], %92 {strides = array<i32>} : memref<64x32xbf16, #tpu.memory_space<vmem>>, vector<16x32xbf16>,
    %c2_76 = arith.constant 2 : index
    %c0_77 = arith.constant 0 : index
    %94 = vector.load %arg1[%c2_76, %c0_77] : memref<16x32xf32, #tpu.memory_space<vmem>>, vector<1x32xf32>
    %c0_78 = arith.constant 0 : index
    %c0_79 = arith.constant 0 : index
    %95 = vector.load %arg12[%c0_78, %c0_79] : memref<16x32xbf16, #tpu.memory_space<vmem>>, vector<16x32xbf16>
    %96 = arith.extf %95 : vector<16x32xbf16> to vector<16x32xf32>
    %97 = vector.broadcast %94 : vector<1x32xf32> to vector<16x32xf32>
    %98 = arith.mulf %97, %96 : vector<16x32xf32>
    %99 = arith.truncf %98 : vector<16x32xf32> to vector<16x32xbf16>
    %c32_80 = arith.constant 32 : index
    %c0_81 = arith.constant 0 : index
    %100 = vector.load %arg11[%c32_80, %c0_81] : memref<64x32xbf16, #tpu.memory_space<vmem>>, vector<16x32xbf16>
    tpu.vector_store %arg11[%c32_80, %c0_81], %99 {strides = array<i32>} : memref<64x32xbf16, #tpu.memory_space<vmem>>, vector<16x32xbf16>,
    %c3_82 = arith.constant 3 : index
    %c0_83 = arith.constant 0 : index
    %101 = vector.load %arg1[%c3_82, %c0_83] : memref<16x32xf32, #tpu.memory_space<vmem>>, vector<1x32xf32>
    %c0_84 = arith.constant 0 : index
    %c0_85 = arith.constant 0 : index
    %102 = vector.load %arg12[%c0_84, %c0_85] : memref<16x32xbf16, #tpu.memory_space<vmem>>, vector<16x32xbf16>
    %103 = arith.extf %102 : vector<16x32xbf16> to vector<16x32xf32>
    %104 = vector.broadcast %101 : vector<1x32xf32> to vector<16x32xf32>
    %105 = arith.mulf %104, %103 : vector<16x32xf32>
    %106 = arith.truncf %105 : vector<16x32xf32> to vector<16x32xbf16>
    %c48_86 = arith.constant 48 : index
    %c0_87 = arith.constant 0 : index
    %107 = vector.load %arg11[%c48_86, %c0_87] : memref<64x32xbf16, #tpu.memory_space<vmem>>, vector<16x32xbf16>
    tpu.vector_store %arg11[%c48_86, %c0_87], %106 {strides = array<i32>} : memref<64x32xbf16, #tpu.memory_space<vmem>>, vector<16x32xbf16>,
    %c0_88 = arith.constant 0 : index
    %c0_89 = arith.constant 0 : index
    %108 = vector.load %arg4[%c0_88, %c0_89] : memref<16x64xbf16, #tpu.memory_space<vmem>>, vector<16x64xbf16>
    %c0_90 = arith.constant 0 : index
    %c0_91 = arith.constant 0 : index
    %109 = vector.load %arg11[%c0_90, %c0_91] : memref<64x32xbf16, #tpu.memory_space<vmem>>, vector<64x32xbf16>
    %cst_92 = arith.constant dense<0.000000e+00> : vector<16x32xf32>
    %110 = tpu.matmul %108, %109, %cst_92 {dimension_numbers = #tpu.dot_dimension_numbers<[1], [0], [0], [1], [0, 0, 1, 1], [], []>} : vector<16x64xbf16>, vector<64x32xbf16>, vector<16x32xf32> -> vector<16x32xf32>
    %c0_93 = arith.constant 0 : index
    %c0_94 = arith.constant 0 : index
    %111 = vector.load %arg7[%c0_93, %c0_94] : memref<16x1xf32, #tpu.memory_space<vmem>>, vector<16x1xf32>
    %112 = vector.broadcast %111 : vector<16x1xf32> to vector<16x32xf32>
    %113 = arith.addf %110, %112 : vector<16x32xf32>
    %cst_95 = arith.constant 0.000000e+00 : f32
    %114 = vector.broadcast %cst_95 : f32 to vector<16x32xf32>
    %115 = arith.maximumf %113, %114 : vector<16x32xf32>
    %116 = arith.truncf %115 : vector<16x32xf32> to vector<16x32xbf16>
    %c32_96 = arith.constant 32 : index
    %c0_97 = arith.constant 0 : index
    %117 = vector.load %arg13[%c32_96, %c0_97] : memref<48x32xbf16, #tpu.memory_space<vmem>>, vector<16x32xbf16>
    tpu.vector_store %arg13[%c32_96, %c0_97], %116 {strides = array<i32>} : memref<48x32xbf16, #tpu.memory_space<vmem>>, vector<16x32xbf16>,
    %c0_98 = arith.constant 0 : index
    %c0_99 = arith.constant 0 : index
    %118 = vector.load %arg8[%c0_98, %c0_99] : memref<1x48xbf16, #tpu.memory_space<vmem>>, vector<1x48xbf16>
    %c0_100 = arith.constant 0 : index
    %c0_101 = arith.constant 0 : index
    %119 = vector.load %arg13[%c0_100, %c0_101] : memref<48x32xbf16, #tpu.memory_space<vmem>>, vector<48x32xbf16>
    %cst_102 = arith.constant dense<0.000000e+00> : vector<1x32xf32>
    %120 = tpu.matmul %118, %119, %cst_102 {dimension_numbers = #tpu.dot_dimension_numbers<[1], [0], [0], [1], [0, 0, 1, 1], [], []>} : vector<1x48xbf16>, vector<48x32xbf16>, vector<1x32xf32> -> vector<1x32xf32>
    %121 = tpu.iota {dimensions = array<i32: 0>} : vector<32x2xi32>
    %122 = tpu.iota {dimensions = array<i32: 1>} : vector<32x2xi32>
    %c16_i32 = arith.constant 16 : i32
    %123 = vector.broadcast %c16_i32 : i32 to vector<32x2xi32>
    %124 = arith.muli %122, %123 : vector<32x2xi32>
    %125 = arith.cmpi sge, %121, %124 : vector<32x2xi32>
    %c16_i32_103 = arith.constant 16 : i32
    %126 = vector.broadcast %c16_i32_103 : i32 to vector<32x2xi32>
    %127 = arith.addi %124, %126 : vector<32x2xi32>
    %128 = arith.cmpi slt, %121, %127 : vector<32x2xi32>
    %129 = arith.andi %125, %128 : vector<32x2xi1>
    %130 = arith.extui %129 : vector<32x2xi1> to vector<32x2xi32>
    %131 = arith.sitofp %130 : vector<32x2xi32> to vector<32x2xf32>
    %cst_104 = arith.constant dense<0.000000e+00> : vector<1x2xf32>
    %132 = tpu.matmul %120, %131, %cst_104 {dimension_numbers = #tpu.dot_dimension_numbers<[1], [0], [0], [1], [0, 0, 1, 1], [], []>} : vector<1x32xf32>, vector<32x2xf32>, vector<1x2xf32> -> vector<1x2xf32>
    %c0_105 = arith.constant 0 : index
    %c0_106 = arith.constant 0 : index
    %133 = vector.load %arg9[%c0_105, %c0_106] : memref<1x1xf32, #tpu.memory_space<vmem>>, vector<1x1xf32>
    %134 = vector.broadcast %133 : vector<1x1xf32> to vector<1x2xf32>
    %135 = arith.addf %132, %134 : vector<1x2xf32>
    %c0_107 = arith.constant 0 : index
    %c0_108 = arith.constant 0 : index
    %c0_109 = arith.constant 0 : index
    %136 = vector.load %arg10[%c0_107, %c0_108, %c0_109] : memref<1x1x2xf32, #tpu.memory_space<vmem>>, vector<1x1x2xf32>
    %137 = vector.shape_cast %136 : vector<1x1x2xf32> to vector<1x2xf32>
    %138 = vector.shape_cast %135 : vector<1x2xf32> to vector<1x1x2xf32>
    tpu.vector_store %arg10[%c0_107, %c0_108, %c0_109], %138 {strides = array<i32>} : memref<1x1x2xf32, #tpu.memory_space<vmem>>, vector<1x1x2xf32>,
    return
  }
  func.func @transform_0(%arg0: i32) -> (i32, i32) {
    %c0_i32 = arith.constant 0 : i32
    %c0_i32_0 = arith.constant 0 : i32
    return %c0_i32, %arg0 : i32, i32
  }
  func.func @transform_1(%arg0: i32) -> (i32, i32) {
    %c0_i32 = arith.constant 0 : i32
    %c0_i32_0 = arith.constant 0 : i32
    %c0_i32_1 = arith.constant 0 : i32
    return %c0_i32, %c0_i32_0 : i32, i32
  }
  func.func @transform_2(%arg0: i32) -> (i32, i32) {
    %c0_i32 = arith.constant 0 : i32
    %c0_i32_0 = arith.constant 0 : i32
    %c0_i32_1 = arith.constant 0 : i32
    return %c0_i32, %c0_i32_0 : i32, i32
  }
  func.func @transform_3(%arg0: i32) -> (i32, i32) {
    %c0_i32 = arith.constant 0 : i32
    %c0_i32_0 = arith.constant 0 : i32
    %c0_i32_1 = arith.constant 0 : i32
    return %c0_i32, %c0_i32_0 : i32, i32
  }
  func.func @transform_4(%arg0: i32) -> (i32, i32) {
    %c0_i32 = arith.constant 0 : i32
    %c0_i32_0 = arith.constant 0 : i32
    %c0_i32_1 = arith.constant 0 : i32
    return %c0_i32, %c0_i32_0 : i32, i32
  }
  func.func @transform_5(%arg0: i32) -> (i32, i32) {
    %c0_i32 = arith.constant 0 : i32
    %c0_i32_0 = arith.constant 0 : i32
    %c0_i32_1 = arith.constant 0 : i32
    return %c0_i32, %c0_i32_0 : i32, i32
  }
  func.func @transform_6(%arg0: i32) -> (i32, i32) {
    %c0_i32 = arith.constant 0 : i32
    %c0_i32_0 = arith.constant 0 : i32
    %c0_i32_1 = arith.constant 0 : i32
    return %c0_i32, %c0_i32_0 : i32, i32
  }
  func.func @transform_7(%arg0: i32) -> (i32, i32) {
    %c0_i32 = arith.constant 0 : i32
    %c0_i32_0 = arith.constant 0 : i32
    %c0_i32_1 = arith.constant 0 : i32
    return %c0_i32, %c0_i32_0 : i32, i32
  }
  func.func @transform_8(%arg0: i32) -> (i32, i32) {
    %c0_i32 = arith.constant 0 : i32
    %c0_i32_0 = arith.constant 0 : i32
    %c0_i32_1 = arith.constant 0 : i32
    return %c0_i32, %c0_i32_0 : i32, i32
  }
  func.func @transform_9(%arg0: i32) -> (i32, i32, i32) {
    %c0_i32 = arith.constant 0 : i32
    %c0_i32_0 = arith.constant 0 : i32
    %c0_i32_1 = arith.constant 0 : i32
    return %arg0, %c0_i32, %c0_i32_0 : i32, i32, i32
  }
}

module attributes {stable_mosaic.version = 11 : i64} {
  func.func @kernel(%arg0: i32, %arg1: memref<16x32xf32, #tpu.memory_space<vmem>>, %arg2: memref<32x64xbf16, #tpu.memory_space<vmem>>, %arg3: memref<32x64xbf16, #tpu.memory_space<vmem>>, %arg4: memref<16x64xbf16, #tpu.memory_space<vmem>>, %arg5: memref<32x1xf32, #tpu.memory_space<vmem>>, %arg6: memref<32x1xf32, #tpu.memory_space<vmem>>, %arg7: memref<16x1xf32, #tpu.memory_space<vmem>>, %arg8: memref<1x48xbf16, #tpu.memory_space<vmem>>, %arg9: memref<1x1xf32, #tpu.memory_space<vmem>>, %arg10: memref<1x1x2xf32, #tpu.memory_space<vmem>>, %arg11: memref<64x32xbf16, #tpu.memory_space<vmem>>, %arg12: memref<16x32xbf16, #tpu.memory_space<vmem>>, %arg13: memref<48x32xbf16, #tpu.memory_space<vmem>>) attributes {dimension_semantics = [#tpu.dimension_semantics<parallel>], iteration_bounds = array<i64: 1>, scalar_prefetch = 0 : i64, scratch_operands = 3 : i64, tpu.core_type = #tpu.core_type<tc>, window_params = [{transform_indices = @transform_0, window_bounds = array<i64: 16, 32>}, {pipeline_mode = #tpu.pipeline_mode<synchronous>, transform_indices = @transform_1, window_bounds = array<i64: 32, 64>}, {pipeline_mode = #tpu.pipeline_mode<synchronous>, transform_indices = @transform_2, window_bounds = array<i64: 32, 64>}, {pipeline_mode = #tpu.pipeline_mode<synchronous>, transform_indices = @transform_3, window_bounds = array<i64: 16, 64>}, {pipeline_mode = #tpu.pipeline_mode<synchronous>, transform_indices = @transform_4, window_bounds = array<i64: 32, 1>}, {pipeline_mode = #tpu.pipeline_mode<synchronous>, transform_indices = @transform_5, window_bounds = array<i64: 32, 1>}, {pipeline_mode = #tpu.pipeline_mode<synchronous>, transform_indices = @transform_6, window_bounds = array<i64: 16, 1>}, {pipeline_mode = #tpu.pipeline_mode<synchronous>, transform_indices = @transform_7, window_bounds = array<i64: 1, 48>}, {pipeline_mode = #tpu.pipeline_mode<synchronous>, transform_indices = @transform_8, window_bounds = array<i64: 1, 1>}, {transform_indices = @transform_9, window_bounds = array<i64: 1, 1, 2>}]} {
    %c0 = arith.constant 0 : index
    %c0_0 = arith.constant 0 : index
    %0 = vector.load %arg1[%c0, %c0_0] : memref<16x32xf32, #tpu.memory_space<vmem>>, vector<1x32xf32>
    %c0_1 = arith.constant 0 : index
    %c0_2 = arith.constant 0 : index
    %1 = vector.load %arg1[%c0_1, %c0_2] : memref<16x32xf32, #tpu.memory_space<vmem>>, vector<16x32xf32>
    %2 = vector.broadcast %0 : vector<1x32xf32> to vector<16x32xf32>
    %3 = arith.mulf %2, %1 : vector<16x32xf32>
    %4 = arith.truncf %3 : vector<16x32xf32> to vector<16x32xbf16>
    %c0_3 = arith.constant 0 : index
    %c0_4 = arith.constant 0 : index
    %5 = vector.load %arg11[%c0_3, %c0_4] : memref<64x32xbf16, #tpu.memory_space<vmem>>, vector<16x32xbf16>
    tpu.vector_store %arg11[%c0_3, %c0_4], %4 {strides = array<i32>} : memref<64x32xbf16, #tpu.memory_space<vmem>>, vector<16x32xbf16>,
    %c1 = arith.constant 1 : index
    %c0_5 = arith.constant 0 : index
    %6 = vector.load %arg1[%c1, %c0_5] : memref<16x32xf32, #tpu.memory_space<vmem>>, vector<1x32xf32>
    %c0_6 = arith.constant 0 : index
    %c0_7 = arith.constant 0 : index
    %7 = vector.load %arg1[%c0_6, %c0_7] : memref<16x32xf32, #tpu.memory_space<vmem>>, vector<16x32xf32>
    %8 = vector.broadcast %6 : vector<1x32xf32> to vector<16x32xf32>
    %9 = arith.mulf %8, %7 : vector<16x32xf32>
    %10 = arith.truncf %9 : vector<16x32xf32> to vector<16x32xbf16>
    %c16 = arith.constant 16 : index
    %c0_8 = arith.constant 0 : index
    %11 = vector.load %arg11[%c16, %c0_8] : memref<64x32xbf16, #tpu.memory_space<vmem>>, vector<16x32xbf16>
    tpu.vector_store %arg11[%c16, %c0_8], %10 {strides = array<i32>} : memref<64x32xbf16, #tpu.memory_space<vmem>>, vector<16x32xbf16>,
    %c2 = arith.constant 2 : index
    %c0_9 = arith.constant 0 : index
    %12 = vector.load %arg1[%c2, %c0_9] : memref<16x32xf32, #tpu.memory_space<vmem>>, vector<1x32xf32>
    %c0_10 = arith.constant 0 : index
    %c0_11 = arith.constant 0 : index
    %13 = vector.load %arg1[%c0_10, %c0_11] : memref<16x32xf32, #tpu.memory_space<vmem>>, vector<16x32xf32>
    %14 = vector.broadcast %12 : vector<1x32xf32> to vector<16x32xf32>
    %15 = arith.mulf %14, %13 : vector<16x32xf32>
    %16 = arith.truncf %15 : vector<16x32xf32> to vector<16x32xbf16>
    %c32 = arith.constant 32 : index
    %c0_12 = arith.constant 0 : index
    %17 = vector.load %arg11[%c32, %c0_12] : memref<64x32xbf16, #tpu.memory_space<vmem>>, vector<16x32xbf16>
    tpu.vector_store %arg11[%c32, %c0_12], %16 {strides = array<i32>} : memref<64x32xbf16, #tpu.memory_space<vmem>>, vector<16x32xbf16>,
    %c3 = arith.constant 3 : index
    %c0_13 = arith.constant 0 : index
    %18 = vector.load %arg1[%c3, %c0_13] : memref<16x32xf32, #tpu.memory_space<vmem>>, vector<1x32xf32>
    %c0_14 = arith.constant 0 : index
    %c0_15 = arith.constant 0 : index
    %19 = vector.load %arg1[%c0_14, %c0_15] : memref<16x32xf32, #tpu.memory_space<vmem>>, vector<16x32xf32>
    %20 = vector.broadcast %18 : vector<1x32xf32> to vector<16x32xf32>
    %21 = arith.mulf %20, %19 : vector<16x32xf32>
    %22 = arith.truncf %21 : vector<16x32xf32> to vector<16x32xbf16>
    %c48 = arith.constant 48 : index
    %c0_16 = arith.constant 0 : index
    %23 = vector.load %arg11[%c48, %c0_16] : memref<64x32xbf16, #tpu.memory_space<vmem>>, vector<16x32xbf16>
    tpu.vector_store %arg11[%c48, %c0_16], %22 {strides = array<i32>} : memref<64x32xbf16, #tpu.memory_space<vmem>>, vector<16x32xbf16>,
    %c0_17 = arith.constant 0 : index
    %c0_18 = arith.constant 0 : index
    %24 = vector.load %arg2[%c0_17, %c0_18] : memref<32x64xbf16, #tpu.memory_space<vmem>>, vector<32x64xbf16>
    %c0_19 = arith.constant 0 : index
    %c0_20 = arith.constant 0 : index
    %25 = vector.load %arg11[%c0_19, %c0_20] : memref<64x32xbf16, #tpu.memory_space<vmem>>, vector<64x32xbf16>
    %cst = arith.constant dense<0.000000e+00> : vector<32x32xf32>
    %26 = tpu.matmul %24, %25, %cst {dimension_numbers = #tpu.dot_dimension_numbers<[1], [0], [0], [1], [0, 0, 1, 1], [], []>} : vector<32x64xbf16>, vector<64x32xbf16>, vector<32x32xf32> -> vector<32x32xf32>
    %c0_21 = arith.constant 0 : index
    %c0_22 = arith.constant 0 : index
    %27 = vector.load %arg5[%c0_21, %c0_22] : memref<32x1xf32, #tpu.memory_space<vmem>>, vector<32x1xf32>
    %28 = vector.broadcast %27 : vector<32x1xf32> to vector<32x32xf32>
    %29 = arith.addf %26, %28 : vector<32x32xf32>
    %cst_23 = arith.constant 0.000000e+00 : f32
    %30 = vector.broadcast %cst_23 : f32 to vector<32x32xf32>
    %31 = arith.maximumf %29, %30 : vector<32x32xf32>
    %32 = vector.extract_strided_slice %31 {offsets = [0, 0], sizes = [16, 32], strides = [1, 1]} : vector<32x32xf32> to vector<16x32xf32>
    %33 = arith.truncf %32 : vector<16x32xf32> to vector<16x32xbf16>
    %c0_24 = arith.constant 0 : index
    %c0_25 = arith.constant 0 : index
    %34 = vector.load %arg13[%c0_24, %c0_25] : memref<48x32xbf16, #tpu.memory_space<vmem>>, vector<16x32xbf16>
    tpu.vector_store %arg13[%c0_24, %c0_25], %33 {strides = array<i32>} : memref<48x32xbf16, #tpu.memory_space<vmem>>, vector<16x32xbf16>,
    %35 = vector.extract_strided_slice %31 {offsets = [16, 0], sizes = [16, 32], strides = [1, 1]} : vector<32x32xf32> to vector<16x32xf32>
    %36 = arith.truncf %35 : vector<16x32xf32> to vector<16x32xbf16>
    %c0_26 = arith.constant 0 : index
    %c0_27 = arith.constant 0 : index
    %37 = vector.load %arg12[%c0_26, %c0_27] : memref<16x32xbf16, #tpu.memory_space<vmem>>, vector<16x32xbf16>
    tpu.vector_store %arg12[%c0_26, %c0_27], %36 {strides = array<i32>} : memref<16x32xbf16, #tpu.memory_space<vmem>>, vector<16x32xbf16>,
    %c0_28 = arith.constant 0 : index
    %c0_29 = arith.constant 0 : index
    %38 = vector.load %arg1[%c0_28, %c0_29] : memref<16x32xf32, #tpu.memory_space<vmem>>, vector<1x32xf32>
    %c0_30 = arith.constant 0 : index
    %c0_31 = arith.constant 0 : index
    %39 = vector.load %arg12[%c0_30, %c0_31] : memref<16x32xbf16, #tpu.memory_space<vmem>>, vector<16x32xbf16>
    %40 = arith.extf %39 : vector<16x32xbf16> to vector<16x32xf32>
    %41 = vector.broadcast %38 : vector<1x32xf32> to vector<16x32xf32>
    %42 = arith.mulf %41, %40 : vector<16x32xf32>
    %43 = arith.truncf %42 : vector<16x32xf32> to vector<16x32xbf16>
    %c0_32 = arith.constant 0 : index
    %c0_33 = arith.constant 0 : index
    %44 = vector.load %arg11[%c0_32, %c0_33] : memref<64x32xbf16, #tpu.memory_space<vmem>>, vector<16x32xbf16>
    tpu.vector_store %arg11[%c0_32, %c0_33], %43 {strides = array<i32>} : memref<64x32xbf16, #tpu.memory_space<vmem>>, vector<16x32xbf16>,
    %c1_34 = arith.constant 1 : index
    %c0_35 = arith.constant 0 : index
    %45 = vector.load %arg1[%c1_34, %c0_35] : memref<16x32xf32, #tpu.memory_space<vmem>>, vector<1x32xf32>
    %c0_36 = arith.constant 0 : index
    %c0_37 = arith.constant 0 : index
    %46 = vector.load %arg12[%c0_36, %c0_37] : memref<16x32xbf16, #tpu.memory_space<vmem>>, vector<16x32xbf16>
    %47 = arith.extf %46 : vector<16x32xbf16> to vector<16x32xf32>
    %48 = vector.broadcast %45 : vector<1x32xf32> to vector<16x32xf32>
    %49 = arith.mulf %48, %47 : vector<16x32xf32>
    %50 = arith.truncf %49 : vector<16x32xf32> to vector<16x32xbf16>
    %c16_38 = arith.constant 16 : index
    %c0_39 = arith.constant 0 : index
    %51 = vector.load %arg11[%c16_38, %c0_39] : memref<64x32xbf16, #tpu.memory_space<vmem>>, vector<16x32xbf16>
    tpu.vector_store %arg11[%c16_38, %c0_39], %50 {strides = array<i32>} : memref<64x32xbf16, #tpu.memory_space<vmem>>, vector<16x32xbf16>,
    %c2_40 = arith.constant 2 : index
    %c0_41 = arith.constant 0 : index
    %52 = vector.load %arg1[%c2_40, %c0_41] : memref<16x32xf32, #tpu.memory_space<vmem>>, vector<1x32xf32>
    %c0_42 = arith.constant 0 : index
    %c0_43 = arith.constant 0 : index
    %53 = vector.load %arg12[%c0_42, %c0_43] : memref<16x32xbf16, #tpu.memory_space<vmem>>, vector<16x32xbf16>
    %54 = arith.extf %53 : vector<16x32xbf16> to vector<16x32xf32>
    %55 = vector.broadcast %52 : vector<1x32xf32> to vector<16x32xf32>
    %56 = arith.mulf %55, %54 : vector<16x32xf32>
    %57 = arith.truncf %56 : vector<16x32xf32> to vector<16x32xbf16>
    %c32_44 = arith.constant 32 : index
    %c0_45 = arith.constant 0 : index
    %58 = vector.load %arg11[%c32_44, %c0_45] : memref<64x32xbf16, #tpu.memory_space<vmem>>, vector<16x32xbf16>
    tpu.vector_store %arg11[%c32_44, %c0_45], %57 {strides = array<i32>} : memref<64x32xbf16, #tpu.memory_space<vmem>>, vector<16x32xbf16>,
    %c3_46 = arith.constant 3 : index
    %c0_47 = arith.constant 0 : index
    %59 = vector.load %arg1[%c3_46, %c0_47] : memref<16x32xf32, #tpu.memory_space<vmem>>, vector<1x32xf32>
    %c0_48 = arith.constant 0 : index
    %c0_49 = arith.constant 0 : index
    %60 = vector.load %arg12[%c0_48, %c0_49] : memref<16x32xbf16, #tpu.memory_space<vmem>>, vector<16x32xbf16>
    %61 = arith.extf %60 : vector<16x32xbf16> to vector<16x32xf32>
    %62 = vector.broadcast %59 : vector<1x32xf32> to vector<16x32xf32>
    %63 = arith.mulf %62, %61 : vector<16x32xf32>
    %64 = arith.truncf %63 : vector<16x32xf32> to vector<16x32xbf16>
    %c48_50 = arith.constant 48 : index
    %c0_51 = arith.constant 0 : index
    %65 = vector.load %arg11[%c48_50, %c0_51] : memref<64x32xbf16, #tpu.memory_space<vmem>>, vector<16x32xbf16>
    tpu.vector_store %arg11[%c48_50, %c0_51], %64 {strides = array<i32>} : memref<64x32xbf16, #tpu.memory_space<vmem>>, vector<16x32xbf16>,
    %c0_52 = arith.constant 0 : index
    %c0_53 = arith.constant 0 : index
    %66 = vector.load %arg3[%c0_52, %c0_53] : memref<32x64xbf16, #tpu.memory_space<vmem>>, vector<32x64xbf16>
    %c0_54 = arith.constant 0 : index
    %c0_55 = arith.constant 0 : index
    %67 = vector.load %arg11[%c0_54, %c0_55] : memref<64x32xbf16, #tpu.memory_space<vmem>>, vector<64x32xbf16>
    %cst_56 = arith.constant dense<0.000000e+00> : vector<32x32xf32>
    %68 = tpu.matmul %66, %67, %cst_56 {dimension_numbers = #tpu.dot_dimension_numbers<[1], [0], [0], [1], [0, 0, 1, 1], [], []>} : vector<32x64xbf16>, vector<64x32xbf16>, vector<32x32xf32> -> vector<32x32xf32>
    %c0_57 = arith.constant 0 : index
    %c0_58 = arith.constant 0 : index
    %69 = vector.load %arg6[%c0_57, %c0_58] : memref<32x1xf32, #tpu.memory_space<vmem>>, vector<32x1xf32>
    %70 = vector.broadcast %69 : vector<32x1xf32> to vector<32x32xf32>
    %71 = arith.addf %68, %70 : vector<32x32xf32>
    %cst_59 = arith.constant 0.000000e+00 : f32
    %72 = vector.broadcast %cst_59 : f32 to vector<32x32xf32>
    %73 = arith.maximumf %71, %72 : vector<32x32xf32>
    %74 = vector.extract_strided_slice %73 {offsets = [0, 0], sizes = [16, 32], strides = [1, 1]} : vector<32x32xf32> to vector<16x32xf32>
    %75 = arith.truncf %74 : vector<16x32xf32> to vector<16x32xbf16>
    %c16_60 = arith.constant 16 : index
    %c0_61 = arith.constant 0 : index
    %76 = vector.load %arg13[%c16_60, %c0_61] : memref<48x32xbf16, #tpu.memory_space<vmem>>, vector<16x32xbf16>
    tpu.vector_store %arg13[%c16_60, %c0_61], %75 {strides = array<i32>} : memref<48x32xbf16, #tpu.memory_space<vmem>>, vector<16x32xbf16>,
    %77 = vector.extract_strided_slice %73 {offsets = [16, 0], sizes = [16, 32], strides = [1, 1]} : vector<32x32xf32> to vector<16x32xf32>
    %78 = arith.truncf %77 : vector<16x32xf32> to vector<16x32xbf16>
    %c0_62 = arith.constant 0 : index
    %c0_63 = arith.constant 0 : index
    %79 = vector.load %arg12[%c0_62, %c0_63] : memref<16x32xbf16, #tpu.memory_space<vmem>>, vector<16x32xbf16>
    tpu.vector_store %arg12[%c0_62, %c0_63], %78 {strides = array<i32>} : memref<16x32xbf16, #tpu.memory_space<vmem>>, vector<16x32xbf16>,
    %c0_64 = arith.constant 0 : index
    %c0_65 = arith.constant 0 : index
    %80 = vector.load %arg1[%c0_64, %c0_65] : memref<16x32xf32, #tpu.memory_space<vmem>>, vector<1x32xf32>
    %c0_66 = arith.constant 0 : index
    %c0_67 = arith.constant 0 : index
    %81 = vector.load %arg12[%c0_66, %c0_67] : memref<16x32xbf16, #tpu.memory_space<vmem>>, vector<16x32xbf16>
    %82 = arith.extf %81 : vector<16x32xbf16> to vector<16x32xf32>
    %83 = vector.broadcast %80 : vector<1x32xf32> to vector<16x32xf32>
    %84 = arith.mulf %83, %82 : vector<16x32xf32>
    %85 = arith.truncf %84 : vector<16x32xf32> to vector<16x32xbf16>
    %c0_68 = arith.constant 0 : index
    %c0_69 = arith.constant 0 : index
    %86 = vector.load %arg11[%c0_68, %c0_69] : memref<64x32xbf16, #tpu.memory_space<vmem>>, vector<16x32xbf16>
    tpu.vector_store %arg11[%c0_68, %c0_69], %85 {strides = array<i32>} : memref<64x32xbf16, #tpu.memory_space<vmem>>, vector<16x32xbf16>,
    %c1_70 = arith.constant 1 : index
    %c0_71 = arith.constant 0 : index
    %87 = vector.load %arg1[%c1_70, %c0_71] : memref<16x32xf32, #tpu.memory_space<vmem>>, vector<1x32xf32>
    %c0_72 = arith.constant 0 : index
    %c0_73 = arith.constant 0 : index
    %88 = vector.load %arg12[%c0_72, %c0_73] : memref<16x32xbf16, #tpu.memory_space<vmem>>, vector<16x32xbf16>
    %89 = arith.extf %88 : vector<16x32xbf16> to vector<16x32xf32>
    %90 = vector.broadcast %87 : vector<1x32xf32> to vector<16x32xf32>
    %91 = arith.mulf %90, %89 : vector<16x32xf32>
    %92 = arith.truncf %91 : vector<16x32xf32> to vector<16x32xbf16>
    %c16_74 = arith.constant 16 : index
    %c0_75 = arith.constant 0 : index
    %93 = vector.load %arg11[%c16_74, %c0_75] : memref<64x32xbf16, #tpu.memory_space<vmem>>, vector<16x32xbf16>
    tpu.vector_store %arg11[%c16_74, %c0_75], %92 {strides = array<i32>} : memref<64x32xbf16, #tpu.memory_space<vmem>>, vector<16x32xbf16>,
    %c2_76 = arith.constant 2 : index
    %c0_77 = arith.constant 0 : index
    %94 = vector.load %arg1[%c2_76, %c0_77] : memref<16x32xf32, #tpu.memory_space<vmem>>, vector<1x32xf32>
    %c0_78 = arith.constant 0 : index
    %c0_79 = arith.constant 0 : index
    %95 = vector.load %arg12[%c0_78, %c0_79] : memref<16x32xbf16, #tpu.memory_space<vmem>>, vector<16x32xbf16>
    %96 = arith.extf %95 : vector<16x32xbf16> to vector<16x32xf32>
    %97 = vector.broadcast %94 : vector<1x32xf32> to vector<16x32xf32>
    %98 = arith.mulf %97, %96 : vector<16x32xf32>
    %99 = arith.truncf %98 : vector<16x32xf32> to vector<16x32xbf16>
    %c32_80 = arith.constant 32 : index
    %c0_81 = arith.constant 0 : index
    %100 = vector.load %arg11[%c32_80, %c0_81] : memref<64x32xbf16, #tpu.memory_space<vmem>>, vector<16x32xbf16>
    tpu.vector_store %arg11[%c32_80, %c0_81], %99 {strides = array<i32>} : memref<64x32xbf16, #tpu.memory_space<vmem>>, vector<16x32xbf16>,
    %c3_82 = arith.constant 3 : index
    %c0_83 = arith.constant 0 : index
    %101 = vector.load %arg1[%c3_82, %c0_83] : memref<16x32xf32, #tpu.memory_space<vmem>>, vector<1x32xf32>
    %c0_84 = arith.constant 0 : index
    %c0_85 = arith.constant 0 : index
    %102 = vector.load %arg12[%c0_84, %c0_85] : memref<16x32xbf16, #tpu.memory_space<vmem>>, vector<16x32xbf16>
    %103 = arith.extf %102 : vector<16x32xbf16> to vector<16x32xf32>
    %104 = vector.broadcast %101 : vector<1x32xf32> to vector<16x32xf32>
    %105 = arith.mulf %104, %103 : vector<16x32xf32>
    %106 = arith.truncf %105 : vector<16x32xf32> to vector<16x32xbf16>
    %c48_86 = arith.constant 48 : index
    %c0_87 = arith.constant 0 : index
    %107 = vector.load %arg11[%c48_86, %c0_87] : memref<64x32xbf16, #tpu.memory_space<vmem>>, vector<16x32xbf16>
    tpu.vector_store %arg11[%c48_86, %c0_87], %106 {strides = array<i32>} : memref<64x32xbf16, #tpu.memory_space<vmem>>, vector<16x32xbf16>,
    %c0_88 = arith.constant 0 : index
    %c0_89 = arith.constant 0 : index
    %108 = vector.load %arg4[%c0_88, %c0_89] : memref<16x64xbf16, #tpu.memory_space<vmem>>, vector<16x64xbf16>
    %c0_90 = arith.constant 0 : index
    %c0_91 = arith.constant 0 : index
    %109 = vector.load %arg11[%c0_90, %c0_91] : memref<64x32xbf16, #tpu.memory_space<vmem>>, vector<64x32xbf16>
    %cst_92 = arith.constant dense<0.000000e+00> : vector<16x32xf32>
    %110 = tpu.matmul %108, %109, %cst_92 {dimension_numbers = #tpu.dot_dimension_numbers<[1], [0], [0], [1], [0, 0, 1, 1], [], []>} : vector<16x64xbf16>, vector<64x32xbf16>, vector<16x32xf32> -> vector<16x32xf32>
    %c0_93 = arith.constant 0 : index
    %c0_94 = arith.constant 0 : index
    %111 = vector.load %arg7[%c0_93, %c0_94] : memref<16x1xf32, #tpu.memory_space<vmem>>, vector<16x1xf32>
    %112 = vector.broadcast %111 : vector<16x1xf32> to vector<16x32xf32>
    %113 = arith.addf %110, %112 : vector<16x32xf32>
    %cst_95 = arith.constant 0.000000e+00 : f32
    %114 = vector.broadcast %cst_95 : f32 to vector<16x32xf32>
    %115 = arith.maximumf %113, %114 : vector<16x32xf32>
    %116 = arith.truncf %115 : vector<16x32xf32> to vector<16x32xbf16>
    %c32_96 = arith.constant 32 : index
    %c0_97 = arith.constant 0 : index
    %117 = vector.load %arg13[%c32_96, %c0_97] : memref<48x32xbf16, #tpu.memory_space<vmem>>, vector<16x32xbf16>
    tpu.vector_store %arg13[%c32_96, %c0_97], %116 {strides = array<i32>} : memref<48x32xbf16, #tpu.memory_space<vmem>>, vector<16x32xbf16>,
    %c0_98 = arith.constant 0 : index
    %c0_99 = arith.constant 0 : index
    %118 = vector.load %arg8[%c0_98, %c0_99] : memref<1x48xbf16, #tpu.memory_space<vmem>>, vector<1x48xbf16>
    %c0_100 = arith.constant 0 : index
    %c0_101 = arith.constant 0 : index
    %119 = vector.load %arg13[%c0_100, %c0_101] : memref<48x32xbf16, #tpu.memory_space<vmem>>, vector<48x32xbf16>
    %cst_102 = arith.constant dense<0.000000e+00> : vector<1x32xf32>
    %120 = tpu.matmul %118, %119, %cst_102 {dimension_numbers = #tpu.dot_dimension_numbers<[1], [0], [0], [1], [0, 0, 1, 1], [], []>} : vector<1x48xbf16>, vector<48x32xbf16>, vector<1x32xf32> -> vector<1x32xf32>
    %121 = tpu.iota {dimensions = array<i32: 0>} : vector<32x2xi32>
    %122 = tpu.iota {dimensions = array<i32: 1>} : vector<32x2xi32>
    %c16_i32 = arith.constant 16 : i32
    %123 = vector.broadcast %c16_i32 : i32 to vector<32x2xi32>
    %124 = arith.muli %122, %123 : vector<32x2xi32>
    %125 = arith.cmpi sge, %121, %124 : vector<32x2xi32>
    %c16_i32_103 = arith.constant 16 : i32
    %126 = vector.broadcast %c16_i32_103 : i32 to vector<32x2xi32>
    %127 = arith.addi %124, %126 : vector<32x2xi32>
    %128 = arith.cmpi slt, %121, %127 : vector<32x2xi32>
    %129 = arith.andi %125, %128 : vector<32x2xi1>
    %130 = arith.extui %129 : vector<32x2xi1> to vector<32x2xi32>
    %131 = arith.sitofp %130 : vector<32x2xi32> to vector<32x2xf32>
    %cst_104 = arith.constant dense<0.000000e+00> : vector<1x2xf32>
    %132 = tpu.matmul %120, %131, %cst_104 {dimension_numbers = #tpu.dot_dimension_numbers<[1], [0], [0], [1], [0, 0, 1, 1], [], []>} : vector<1x32xf32>, vector<32x2xf32>, vector<1x2xf32> -> vector<1x2xf32>
    %c0_105 = arith.constant 0 : index
    %c0_106 = arith.constant 0 : index
    %133 = vector.load %arg9[%c0_105, %c0_106] : memref<1x1xf32, #tpu.memory_space<vmem>>, vector<1x1xf32>
    %134 = vector.broadcast %133 : vector<1x1xf32> to vector<1x2xf32>
    %135 = arith.addf %132, %134 : vector<1x2xf32>
    %c0_107 = arith.constant 0 : index
    %c0_108 = arith.constant 0 : index
    %c0_109 = arith.constant 0 : index
    %136 = vector.load %arg10[%c0_107, %c0_108, %c0_109] : memref<1x1x2xf32, #tpu.memory_space<vmem>>, vector<1x1x2xf32>
    %137 = vector.shape_cast %136 : vector<1x1x2xf32> to vector<1x2xf32>
    %138 = vector.shape_cast %135 : vector<1x2xf32> to vector<1x1x2xf32>
    tpu.vector_store %arg10[%c0_107, %c0_108, %c0_109], %138 {strides = array<i32>} : memref<1x1x2xf32, #tpu.memory_space<vmem>>, vector<1x1x2xf32>,
    return
  }
  func.func @transform_0(%arg0: i32) -> (i32, i32) {
    %c0_i32 = arith.constant 0 : i32
    %c0_i32_0 = arith.constant 0 : i32
    return %c0_i32, %arg0 : i32, i32
  }
  func.func @transform_1(%arg0: i32) -> (i32, i32) {
    %c0_i32 = arith.constant 0 : i32
    %c0_i32_0 = arith.constant 0 : i32
    %c0_i32_1 = arith.constant 0 : i32
    return %c0_i32, %c0_i32_0 : i32, i32
  }
  func.func @transform_2(%arg0: i32) -> (i32, i32) {
    %c0_i32 = arith.constant 0 : i32
    %c0_i32_0 = arith.constant 0 : i32
    %c0_i32_1 = arith.constant 0 : i32
    return %c0_i32, %c0_i32_0 : i32, i32
  }
  func.func @transform_3(%arg0: i32) -> (i32, i32) {
    %c0_i32 = arith.constant 0 : i32
    %c0_i32_0 = arith.constant 0 : i32
    %c0_i32_1 = arith.constant 0 : i32
    return %c0_i32, %c0_i32_0 : i32, i32
  }
  func.func @transform_4(%arg0: i32) -> (i32, i32) {
    %c0_i32 = arith.constant 0 : i32
    %c0_i32_0 = arith.constant 0 : i32
    %c0_i32_1 = arith.constant 0 : i32
    return %c0_i32, %c0_i32_0 : i32, i32
  }
  func.func @transform_5(%arg0: i32) -> (i32, i32) {
    %c0_i32 = arith.constant 0 : i32
    %c0_i32_0 = arith.constant 0 : i32
    %c0_i32_1 = arith.constant 0 : i32
    return %c0_i32, %c0_i32_0 : i32, i32
  }
  func.func @transform_6(%arg0: i32) -> (i32, i32) {
    %c0_i32 = arith.constant 0 : i32
    %c0_i32_0 = arith.constant 0 : i32
    %c0_i32_1 = arith.constant 0 : i32
    return %c0_i32, %c0_i32_0 : i32, i32
  }
  func.func @transform_7(%arg0: i32) -> (i32, i32) {
    %c0_i32 = arith.constant 0 : i32
    %c0_i32_0 = arith.constant 0 : i32
    %c0_i32_1 = arith.constant 0 : i32
    return %c0_i32, %c0_i32_0 : i32, i32
  }
  func.func @transform_8(%arg0: i32) -> (i32, i32) {
    %c0_i32 = arith.constant 0 : i32
    %c0_i32_0 = arith.constant 0 : i32
    %c0_i32_1 = arith.constant 0 : i32
    return %c0_i32, %c0_i32_0 : i32, i32
  }
  func.func @transform_9(%arg0: i32) -> (i32, i32, i32) {
    %c0_i32 = arith.constant 0 : i32
    %c0_i32_0 = arith.constant 0 : i32
    %c0_i32_1 = arith.constant 0 : i32
    return %arg0, %c0_i32, %c0_i32_0 : i32, i32, i32
  }
}

</mosaic_0001>

<bundles_post_ra>
// kernel: tpu_custom_call.1
= control target key start
LH: loop header
LB: loop body
LE: loop exit
PB: predicated region body
PF: predicated region fallthrough
CT: control target
= control target key end

     0   :  { %s970_s0 = inlined_call_operand.vmem [shape: f32[16,32], index: 0, kind: input, shape index: {}]   ;;  %s971_s1 = inlined_call_operand.vmem [shape: bf16[32,64], index: 1, kind: input, shape index: {}]   ;;  %s972_s2 = inlined_call_operand.vmem [shape: bf16[32,64], index: 2, kind: input, shape index: {}]   ;;  %s973_s3 = inlined_call_operand.vmem [shape: bf16[16,64], index: 3, kind: input, shape index: {}]   ;;  %s974_s4 = inlined_call_operand.vmem [shape: f32[32,1], index: 4, kind: input, shape index: {}]   ;;  %s975_s5 = inlined_call_operand.vmem [shape: f32[32,1], index: 5, kind: input, shape index: {}]   ;;  %s976_s6 = inlined_call_operand.vmem [shape: f32[16,1], index: 6, kind: input, shape index: {}]   ;;  %s977_s7 = inlined_call_operand.vmem [shape: bf16[1,48], index: 7, kind: input, shape index: {}]   ;;  %s978_s8 = inlined_call_operand.<no memory space> [shape: f32[1,1], index: 8, kind: input, shape index: {}]   ;;  %s979_s9 = inlined_call_operand.hbm [shape: f32[1,1,2], index: 9, kind: output, shape index: {}]  }
   0x1   :  { %v14_v0 = vstv %s978_s8 }
   0x2   :  { %15 = vst [vmem:[#allocation5] sm:$0x1] %v14_v0 }
   0x3   :  { %v68_v1 = vld [vmem:[%s970_s0] sm:$0xff]  ;;  %v69_v2 = vld [vmem:[%s970_s0 + $0x8] sm:$0xff]  ;;  %v773_v5 = vmov 0   ;;  %v91_v7 = vld [vmem:[%s974_s4 + $0x10] sm:$0xff]  ;;  %vm44_vm0 = vcmask 257024  }
   0x4   :  { %v735_v3 = vld [vmem:[%s970_s0 + $0x3] ss:$0 sm:$0xff]  ;;  %v736_v4 = vld [vmem:[%s970_s0 + $0x2] ss:$0 sm:$0xff]  ;;  %732 = vset.pattern.permute.xlu0 %v773_v5  ;;  %734 = vset.pattern.permute.xlu2 %v773_v5  ;;  %v737_v6 = vld [vmem:[%s970_s0 + $0x1] ss:$0 sm:$0xff] }
   0x5   :  { %733 = vset.pattern.permute.xlu1 %v773_v5  ;;  %v71_v8 = vmul.f32 %v735_v3, %v68_v1  ;;  %v72_v9 = vmul.f32 %v735_v3, %v69_v2  ;;  %v61_v10 = vmul.f32 %v736_v4, %v68_v1  ;;  %v62_v11 = vmul.f32 %v736_v4, %v69_v2  ;;  %v738_v12 = vld [vmem:[%s970_s0] ss:$0 sm:$0xff]  ;;  %v92_v23 = vld [vmem:[%s974_s4 + $0x18] sm:$0xff] }
   0x6   :  { %105 = vperm.xlu0 %732, %v91_v7   ;;  %v51_v13 = vmul.f32 %v737_v6, %v68_v1  ;;  %v52_v14 = vmul.f32 %v737_v6, %v69_v2  ;;  %v40_v19 = vmul.f32 %v738_v12, %v68_v1  ;;  %v41_v20 = vmul.f32 %v738_v12, %v69_v2 }
   0x7   :  { %v73_v15 = vpack.c.bf16 %v71_v8, %v71_v8  ;;  %v74_v16 = vpack.c.bf16 %v72_v9, %v72_v9  ;;  %v63_v17 = vpack.c.bf16 %v61_v10, %v61_v10  ;;  %v64_v18 = vpack.c.bf16 %v62_v11, %v62_v11 }
   0x8   :  { %v53_v21 = vpack.c.bf16 %v51_v13, %v51_v13  ;;  %v54_v22 = vpack.c.bf16 %v52_v14, %v52_v14 }
   0x9   :  { %75 = vst.msk [vmem:[#allocation2 + $0x18] sm:$0xf] %vm44_vm0, %v73_v15 }
   0xa   :  { %76 = vst.msk [vmem:[#allocation2 + $0x1c] sm:$0xf] %vm44_vm0, %v74_v16 }
   0xb   :  { %16 = vsyncpa [#allocation7], 0  ;;  %65 = vst.msk [vmem:[#allocation2 + $0x10] sm:$0xf] %vm44_vm0, %v63_v17  ;;  %v42_v24 = vpack.c.bf16 %v40_v19, %v40_v19  ;;  %v43_v25 = vpack.c.bf16 %v41_v20, %v41_v20  ;;  %v245_v27 = vld [vmem:[%s975_s5] sm:$0xff]  ;;  %v399_v31 = vld [vmem:[%s976_s6 + $0x8] sm:$0xff] }
   0xc   :  { %66 = vst.msk [vmem:[#allocation2 + $0x14] sm:$0xf] %vm44_vm0, %v64_v18  ;;  %v398_v28 = vld [vmem:[%s976_s6] sm:$0xff]  ;;  %v90_v32 = vld [vmem:[%s974_s4 + $0x8] sm:$0xff]  ;;  %vm147_vm1 = vcmask 523264   ;;  %v247_v15 = vld [vmem:[%s975_s5 + $0x10] sm:$0xff] }
   0xd   :  { %55 = vst.msk [vmem:[#allocation2 + $0x8] sm:$0xf] %vm44_vm0, %v53_v21  ;;  %402 = vperm.xlu2 %734, %v398_v28   ;;  %v677_v34 = vld [vmem:[%s971_s1] sm:$0xff]  ;;  %v678_v36 = vld [vmem:[%s971_s1 + $0x8] sm:$0xff]  ;;  %261 = vperm.xlu1 %733, %v247_v15   ;;  %v248_v20 = vld [vmem:[%s975_s5 + $0x18] sm:$0xff]  ;;  %vm487_vm7 = vcmask 392192  }
   0xe   :  { %110 = vperm.xlu0 %732, %v92_v23   ;;  %56 = vst.msk [vmem:[#allocation2 + $0xc] sm:$0xf] %vm44_vm0, %v54_v22  ;;  %v89_v35 = vld [vmem:[%s974_s4] sm:$0xff]  ;;  %v246_v22 = vld [vmem:[%s975_s5 + $0x8] sm:$0xff]  ;;  %vm540_vm15 = vcmask 261120   ;;  %s573_s19 = sshll.u32 %s979_s9, 4  ;;  %s574_s19 = int_to_ptr.hbm [resolvable:$true] %s573_s19 }
   0xf   :  { %45 = vst.msk [vmem:[#allocation2] sm:$0xf] %vm44_vm0, %v42_v24  ;;  %v739_v60 = vld [vmem:[%s970_s0] ss:$0 sm:$0xff]  ;;  %v740_v61 = vld [vmem:[%s970_s0 + $0x1] ss:$0 sm:$0xff] }
  0x10   :  { %46 = vst.msk [vmem:[#allocation2 + $0x4] sm:$0xf] %vm44_vm0, %v43_v25  ;;  %v741_v63 = vld [vmem:[%s970_s0 + $0x2] ss:$0 sm:$0xff]  ;;  %v742_v2 = vld [vmem:[%s970_s0 + $0x3] ss:$0 sm:$0xff] }
  0x11   :  { %v682_v26 = vld [vmem:[#allocation2 + $0x18] sm:$0xff]  ;;  %v533_v24 = vld [vmem:[#allocation5] sm:$0x1]  ;;  %v684_v28 = vld [vmem:[%s972_s2 + $0x8] sm:$0xff] }
  0x12   :  { %158 = vmatpush.bf16.msra.mxu0 %v682_v26 }
  0x13   :  { %v681_v29 = vld [vmem:[#allocation2 + $0x10] sm:$0xff] }
  0x15   :  { %v680_v30 = vld [vmem:[#allocation2 + $0x8] sm:$0xff]  ;;  %407 = vperm.xlu2 %734, %v399_v31   ;;  %266 = vperm.xlu1 %733, %v248_v20  }
  0x16   :  { %251 = vperm.xlu0 %732, %v245_v27   ;;  %159 = vmatpush.bf16.msra.mxu0 %v681_v29  ;;  %v683_v27 = vld [vmem:[%s972_s2] sm:$0xff] }
  0x17   :  { %v679_v33 = vld [vmem:[#allocation2] sm:$0xff] }
  0x1a   :  { %160 = vmatpush.bf16.msra.mxu0 %v680_v30 }
  0x1d   :  { %95 = vperm.xlu2 %734, %v89_v35   ;;  %256 = vperm.xlu1 %733, %v246_v22  }
  0x1e   :  { %100 = vperm.xlu0 %732, %v90_v32   ;;  %161 = vmatpush.bf16.msra.mxu0 %v679_v33 }
  0x21   :  { %606 = vmatmul.msk.bf16.vlgmr.msra.gmra.mxu0 %vm147_vm1, %v677_v34 }
  0x25   :  { %536 = vperm.xlu1 %733, %v533_v24  }
  0x31   :  { %607 = vmatmul.msk.bf16.gmra.mxu0 %vm147_vm1, %v678_v36 }
  0x67   :  { %v884_v38 = vpop.permute.xlu2 %402 }
  0x6f   :  { %v886_v40 = vpop.permute.xlu2 %407 }
  0x77   :  { %v96_v42 = vpop.permute.xlu2 %95 }
  0x78   :  { %v106_v37 = vpop.permute.xlu0 %105 }
  0x7f   :  { %v262_v29 = vpop.permute.xlu1 %261 }
  0x80   :  { %v111_v39 = vpop.permute.xlu0 %110 }
  0x87   :  { %v267_v30 = vpop.permute.xlu1 %266 }
  0x88   :  { %v888_v41 = vpop.permute.xlu0 %251 }
  0x8f   :  { %v257_v35 = vpop.permute.xlu1 %256 }
  0x90   :  { %v101_v47 = vpop.permute.xlu0 %100 }
  0x9e   :  { %v163_v43 = vpop.f32.mrf.mxu0 }
  0x9f   :  { %v164_v44 = vadd.f32 %v163_v43, %v96_v42 }
  0xa1   :  { %v173_v45 = vmax.f32 %v164_v44, 0.0 }
  0xa3   :  { %v177_v46 = vpack.c.bf16 %v173_v45, %v173_v45 }
  0xa5   :  { %179 = vst.msk [vmem:[#allocation4] sm:$0xf] %vm44_vm0, %v177_v46 }
  0xa6   :  { %v165_v48 = vpop.f32.mrf.mxu0 }
  0xa7   :  { %v166_v49 = vadd.f32 %v165_v48, %v101_v47 }
  0xa9   :  { %v174_v50 = vmax.f32 %v166_v49, 0.0 }
  0xab   :  { %v178_v51 = vpack.c.bf16 %v174_v50, %v174_v50  ;;  %v743_v50 = vld [vmem:[%s970_s0 + $0x3] ss:$0 sm:$0xff] }
  0xad   :  { %180 = vst.msk [vmem:[#allocation4 + $0x4] sm:$0xf] %vm44_vm0, %v178_v51  ;;  %v744_v51 = vld [vmem:[%s970_s0 + $0x2] ss:$0 sm:$0xff] }
  0xae   :  { %v168_v52 = vpop.f32.mrf.mxu0 }
  0xaf   :  { %v169_v53 = vadd.f32 %v168_v52, %v106_v37 }
  0xb1   :  { %v175_v54 = vmax.f32 %v169_v53, 0.0  ;;  %v745_v53 = vld [vmem:[%s970_s0 + $0x1] ss:$0 sm:$0xff] }
  0xb3   :  { %v181_v55 = vpack.c.bf16 %v175_v54, %v175_v54 }
  0xb5   :  { %183 = vst.msk [vmem:[#allocation3] sm:$0xf] %vm44_vm0, %v181_v55 }
  0xb6   :  { %v170_v56 = vpop.f32.mrf.mxu0 }
  0xb7   :  { %v171_v57 = vadd.f32 %v170_v56, %v111_v39  ;;  %v746_v56 = vld [vmem:[%s970_s0] ss:$0 sm:$0xff] }
  0xb9   :  { %v176_v58 = vmax.f32 %v171_v57, 0.0 }
  0xbb   :  { %v182_v59 = vpack.c.bf16 %v176_v58, %v176_v58 }
  0xbd   :  { %184 = vst.msk [vmem:[#allocation3 + $0x4] sm:$0xf] %vm44_vm0, %v182_v59 }
  0xc4   :  { %v698_v62 = vld [vmem:[#allocation3] sm:$0xff]  }
  0xc5   :  { %v699_v0 = vunpack.c.l.bf16 %v698_v62  ;;  %v700_v1 = vunpack.c.h.bf16 %v698_v62 }
  0xc7   :  { %v191_v3 = vmul.f32 %v739_v60, %v699_v0  ;;  %v192_v4 = vmul.f32 %v739_v60, %v700_v1  ;;  %v203_v5 = vmul.f32 %v740_v61, %v699_v0  ;;  %v204_v6 = vmul.f32 %v740_v61, %v700_v1 }
  0xc8   :  { %v215_v7 = vmul.f32 %v741_v63, %v699_v0  ;;  %v216_v8 = vmul.f32 %v741_v63, %v700_v1  ;;  %v227_v12 = vmul.f32 %v742_v2, %v699_v0  ;;  %v228_v14 = vmul.f32 %v742_v2, %v700_v1 }
  0xc9   :  { %v193_v9 = vpack.c.bf16 %v191_v3, %v191_v3  ;;  %v194_v10 = vpack.c.bf16 %v192_v4, %v192_v4  ;;  %v205_v11 = vpack.c.bf16 %v203_v5, %v203_v5  ;;  %v206_v13 = vpack.c.bf16 %v204_v6, %v204_v6 }
  0xca   :  { %v217_v16 = vpack.c.bf16 %v215_v7, %v215_v7  ;;  %v218_v17 = vpack.c.bf16 %v216_v8, %v216_v8  ;;  %v229_v18 = vpack.c.bf16 %v227_v12, %v227_v12  ;;  %v230_v19 = vpack.c.bf16 %v228_v14, %v228_v14 }
  0xcb   :  { %195 = vst.msk [vmem:[#allocation2] sm:$0xf] %vm44_vm0, %v193_v9 }
  0xcc   :  { %196 = vst.msk [vmem:[#allocation2 + $0x4] sm:$0xf] %vm44_vm0, %v194_v10 }
  0xcd   :  { %207 = vst.msk [vmem:[#allocation2 + $0x8] sm:$0xf] %vm44_vm0, %v205_v11 }
  0xce   :  { %208 = vst.msk [vmem:[#allocation2 + $0xc] sm:$0xf] %vm44_vm0, %v206_v13  ;;  %v689_v13 = vld [vmem:[%s973_s3] sm:$0xff] }
  0xcf   :  { %219 = vst.msk [vmem:[#allocation2 + $0x10] sm:$0xf] %vm44_vm0, %v217_v16 }
  0xd0   :  { %220 = vst.msk [vmem:[#allocation2 + $0x14] sm:$0xf] %vm44_vm0, %v218_v17 }
  0xd1   :  { %231 = vst.msk [vmem:[#allocation2 + $0x18] sm:$0xf] %vm44_vm0, %v229_v18 }
  0xd2   :  { %232 = vst.msk [vmem:[#allocation2 + $0x1c] sm:$0xf] %vm44_vm0, %v230_v19 }
  0xd3   :  { %v685_v26 = vld [vmem:[#allocation2] sm:$0xff] }
  0xd5   :  { %v686_v25 = vld [vmem:[#allocation2 + $0x8] sm:$0xff] }
  0xd7   :  { %v687_v23 = vld [vmem:[#allocation2 + $0x10] sm:$0xff] }
  0xd9   :  { %v688_v21 = vld [vmem:[#allocation2 + $0x18] sm:$0xff] }
  0xda   :  { %313 = vmatpush.bf16.msra.mxu1 %v688_v21  ;;  %v504_v21 = vlaneseq }
  0xdc   :  { %v505_v24 = vshrl.u32 %v504_v21, 7 }
  0xde   :  { %314 = vmatpush.bf16.msra.mxu1 %v687_v23  ;;  %v510_v23 = vand.u32 127, %v504_v21 }
  0xe2   :  { %315 = vmatpush.bf16.msra.mxu1 %v686_v25  ;;  %v511_v25 = vmul.u32 16, %v510_v23 }
  0xe4   :  { %vm512_vm11 = vcmp.ge.s32.totalorder %v505_v24, %v511_v25 }
  0xe6   :  { %316 = vmatpush.bf16.msra.mxu1 %v685_v26 }
  0xe9   :  { %632 = vmatmul.msk.bf16.vlgmr.msra.gmra.mxu1 %vm147_vm1, %v683_v27  ;;  %v508_v27 = vadd.s32 24, %v505_v24 }
  0xeb   :  { %vm515_vm2 = vcmp.ge.s32.totalorder %v508_v27, %v511_v25 }
  0xf9   :  { %633 = vmatmul.msk.bf16.gmra.mxu1 %vm147_vm1, %v684_v28  ;;  %v516_v28 = vadd.s32 16, %v511_v25 }
  0xfb   :  { %vm520_vm3 = vcmp.lt.s32.totalorder %v508_v27, %v516_v28  ;;  %vm517_vm12 = vcmp.lt.s32.totalorder %v505_v24, %v516_v28 }
  0xfc   :  { %vm524_vm4 = vmand %vm515_vm2, %vm520_vm3 }
  0xfd   :  { %vm521_vm14 = vmand %vm512_vm11, %vm517_vm12 }
 0x166   :  { %v318_v31 = vpop.f32.mrf.mxu1 }
 0x167   :  { %v319_v32 = vadd.f32 %v318_v31, %v888_v41  ;;  %v694_v31 = vld [vmem:[#allocation4] sm:$0xff] }
 0x169   :  { %v328_v33 = vmax.f32 %v319_v32, 0.0  ;;  %v774_v32 = vmov 1.0  }
 0x16b   :  { %v332_v34 = vpack.c.bf16 %v328_v33, %v328_v33 }
 0x16d   :  { %334 = vst.msk [vmem:[#allocation4 + $0x8] sm:$0xf] %vm44_vm0, %v332_v34 }
 0x16e   :  { %v320_v36 = vpop.f32.mrf.mxu1 }
 0x16f   :  { %v321_v37 = vadd.f32 %v320_v36, %v257_v35  ;;  %v537_v35 = vpop.permute.xlu1 %536 }
 0x170   :  { %v539_v36 = vperm.slane %v537_v35, 0 }
 0x171   :  { %v329_v39 = vmax.f32 %v321_v37, 0.0 }
 0x173   :  { %v333_v42 = vpack.c.bf16 %v329_v39, %v329_v39 }
 0x175   :  { %335 = vst.msk [vmem:[#allocation4 + $0xc] sm:$0xf] %vm44_vm0, %v333_v42 }
 0x176   :  { %v323_v43 = vpop.f32.mrf.mxu1 }
 0x177   :  { %v324_v44 = vadd.f32 %v323_v43, %v262_v29  ;;  %v507_v29 = vadd.s32 16, %v505_v24 }
 0x179   :  { %v330_v45 = vmax.f32 %v324_v44, 0.0  ;;  %vm514_vm5 = vcmp.ge.s32.totalorder %v507_v29, %v511_v25  ;;  %vm519_vm6 = vcmp.lt.s32.totalorder %v507_v29, %v516_v28 }
 0x17a   :  { %vm523_vm10 = vmand %vm514_vm5, %vm519_vm6 }
 0x17b   :  { %v336_v46 = vpack.c.bf16 %v330_v45, %v330_v45 }
 0x17d   :  { %338 = vst.msk [vmem:[#allocation3] sm:$0xf] %vm44_vm0, %v336_v46 }
 0x17e   :  { %v325_v47 = vpop.f32.mrf.mxu1 }
 0x17f   :  { %v326_v48 = vadd.f32 %v325_v47, %v267_v30  ;;  %v506_v30 = vadd.s32 8, %v505_v24 }
 0x181   :  { %v331_v41 = vmax.f32 %v326_v48, 0.0  ;;  %vm513_vm8 = vcmp.ge.s32.totalorder %v506_v30, %v511_v25  ;;  %vm518_vm9 = vcmp.lt.s32.totalorder %v506_v30, %v516_v28 }
 0x182   :  { %vm522_vm13 = vmand %vm513_vm8, %vm518_vm9 }
 0x183   :  { %v337_v49 = vpack.c.bf16 %v331_v41, %v331_v41 }
 0x185   :  { %339 = vst.msk [vmem:[#allocation3 + $0x4] sm:$0xf] %vm44_vm0, %v337_v49 }
 0x18c   :  { %v726_v52 = vld [vmem:[#allocation3] sm:$0xff]  }
 0x18d   :  { %v727_v54 = vunpack.c.l.bf16 %v726_v52  ;;  %v728_v55 = vunpack.c.h.bf16 %v726_v52 }
 0x18f   :  { %v382_v57 = vmul.f32 %v743_v50, %v727_v54  ;;  %v383_v58 = vmul.f32 %v743_v50, %v728_v55  ;;  %v370_v59 = vmul.f32 %v744_v51, %v727_v54  ;;  %v371_v60 = vmul.f32 %v744_v51, %v728_v55 }
 0x190   :  { %v358_v61 = vmul.f32 %v745_v53, %v727_v54  ;;  %v359_v62 = vmul.f32 %v745_v53, %v728_v55  ;;  %v346_v2 = vmul.f32 %v746_v56, %v727_v54  ;;  %v347_v4 = vmul.f32 %v746_v56, %v728_v55 }
 0x191   :  { %v384_v63 = vpack.c.bf16 %v382_v57, %v382_v57  ;;  %v385_v0 = vpack.c.bf16 %v383_v58, %v383_v58  ;;  %v372_v1 = vpack.c.bf16 %v370_v59, %v370_v59  ;;  %v373_v3 = vpack.c.bf16 %v371_v60, %v371_v60 }
 0x192   :  { %v360_v5 = vpack.c.bf16 %v358_v61, %v358_v61  ;;  %v361_v6 = vpack.c.bf16 %v359_v62, %v359_v62  ;;  %v348_v7 = vpack.c.bf16 %v346_v2, %v346_v2  ;;  %v349_v8 = vpack.c.bf16 %v347_v4, %v347_v4 }
 0x193   :  { %386 = vst.msk [vmem:[#allocation2 + $0x18] sm:$0xf] %vm44_vm0, %v384_v63 }
 0x194   :  { %387 = vst.msk [vmem:[#allocation2 + $0x1c] sm:$0xf] %vm44_vm0, %v385_v0 }
 0x195   :  { %374 = vst.msk [vmem:[#allocation2 + $0x10] sm:$0xf] %vm44_vm0, %v372_v1 }
 0x196   :  { %375 = vst.msk [vmem:[#allocation2 + $0x14] sm:$0xf] %vm44_vm0, %v373_v3 }
 0x197   :  { %362 = vst.msk [vmem:[#allocation2 + $0x8] sm:$0xf] %vm44_vm0, %v360_v5 }
 0x198   :  { %363 = vst.msk [vmem:[#allocation2 + $0xc] sm:$0xf] %vm44_vm0, %v361_v6 }
 0x199   :  { %350 = vst.msk [vmem:[#allocation2] sm:$0xf] %vm44_vm0, %v348_v7 }
 0x19a   :  { %351 = vst.msk [vmem:[#allocation2 + $0x4] sm:$0xf] %vm44_vm0, %v349_v8 }
 0x19b   :  { %v693_v9 = vld [vmem:[#allocation2 + $0x18] sm:$0xff] }
 0x19c   :  { %446 = vmatpush.bf16.msra.mxu2 %v693_v9 }
 0x19d   :  { %v692_v10 = vld [vmem:[#allocation2 + $0x10] sm:$0xff] }
 0x19f   :  { %v691_v11 = vld [vmem:[#allocation2 + $0x8] sm:$0xff] }
 0x1a0   :  { %447 = vmatpush.bf16.msra.mxu2 %v692_v10 }
 0x1a1   :  { %v690_v12 = vld [vmem:[#allocation2] sm:$0xff] }
 0x1a4   :  { %448 = vmatpush.bf16.msra.mxu2 %v691_v11 }
 0x1a8   :  { %449 = vmatpush.bf16.msra.mxu2 %v690_v12 }
 0x1ab   :  { %654 = vmatmul.msk.bf16.vlgmr.msra.gmra.mxu2 %vm147_vm1, %v689_v13 }
 0x22e   :  { %v451_v14 = vpop.f32.mrf.mxu2 }
 0x22f   :  { %v452_v15 = vadd.f32 %v451_v14, %v884_v38  ;;  %v695_v38 = vld [vmem:[#allocation4 + $0x8] sm:$0xff] }
 0x231   :  { %v456_v16 = vmax.f32 %v452_v15, 0.0 }
 0x233   :  { %v458_v17 = vpack.c.bf16 %v456_v16, %v456_v16 }
 0x235   :  { %460 = vst.msk [vmem:[#allocation4 + $0x10] sm:$0xf] %vm44_vm0, %v458_v17 }
 0x236   :  { %v453_v18 = vpop.f32.mrf.mxu2 }
 0x237   :  { %v454_v19 = vadd.f32 %v453_v18, %v886_v40  ;;  %v462_v40 = vld [vmem:[%s977_s7] sm:$0x1]  ;;  %s775_s7 = smov [#allocation6]  }
 0x238   :  { %s571_s4 = sshll.u32 %s775_s7, 4  ;;  %s572_s4 = int_to_ptr.vmem [resolvable:$true] %s571_s4 }
 0x239   :  { %v457_v20 = vmax.f32 %v454_v19, 0.0 }
 0x23b   :  { %v459_v22 = vpack.c.bf16 %v457_v20, %v457_v20 }
 0x23d   :  { %461 = vst.msk [vmem:[#allocation4 + $0x14] sm:$0xf] %vm44_vm0, %v459_v22  ;;  %vm564_vm0 = vcmask 8192  }
 0x244   :  { %v696_v26 = vld [vmem:[#allocation4 + $0x10] sm:$0xff] }
 0x245   :  { %496 = vmatpush.bf16.msra.mxu3 %v696_v26 }
 0x249   :  { %497 = vmatpush.bf16.msra.mxu3 %v695_v38 }
 0x24d   :  { %498 = vmatpush.bf16.msra.mxu3 %v694_v31 }
 0x250   :  { %667 = vmatmul.msk.bf16.vlgmr.msra.gmra.mxu3 %vm487_vm7, %v462_v40 }
 0x251   :  { %672 = vmatpush.msk.msrb.mxu3 %vm524_vm4, %v774_v32 }
 0x253   :  { %673 = vmatpush.msk.msrb.mxu3 %vm523_vm10, %v774_v32 }
 0x255   :  { %674 = vmatpush.msk.msrb.mxu3 %vm522_vm13, %v774_v32 }
 0x257   :  { %675 = vmatpush.msk.msrb.mxu3 %vm521_vm14, %v774_v32 }
 0x2d3   :  { %v500_v33 = vpop.f32.mrf.mxu3 }
 0x2d4   :  { %676 = vmatmul.msk.f32.vlgmr.msrb.gmra.mxu3 %vm540_vm15, %v500_v33 }
 0x2db   :  { %v502_v34 = vpop.f32.mrf.mxu3 }
 0x357   :  { %v561_v37 = vpop.f32.mrf.mxu3 }
 0x358   :  { %v562_v39 = vadd.f32 %v561_v37, %v539_v36 }
 0x35a   :  { %565 = vst.msk [vmem:[#allocation6] sm:$0x1] %vm564_vm0, %v562_v39 }
 0x35b   :  { %576 = dma.vmem_to_hbm [thread:$0]  %s572_s4, 16, %s574_s19, [#allocation7]  }
 0x35c   :  { %771 = dma.done.wait [#allocation7], 16  }
 0x35d   :  { %772 = vsyncadd [#allocation7], 4294967280 }
 0x35e   :  { %581 = vsyncpa [#allocation7], 1 }

// kernel: tpu_custom_call.1
= control target key start
LH: loop header
LB: loop body
LE: loop exit
PB: predicated region body
PF: predicated region fallthrough
CT: control target
= control target key end

     0   :  { %s970_s0 = inlined_call_operand.vmem [shape: f32[16,32], index: 0, kind: input, shape index: {}]   ;;  %s971_s1 = inlined_call_operand.vmem [shape: bf16[32,64], index: 1, kind: input, shape index: {}]   ;;  %s972_s2 = inlined_call_operand.vmem [shape: bf16[32,64], index: 2, kind: input, shape index: {}]   ;;  %s973_s3 = inlined_call_operand.vmem [shape: bf16[16,64], index: 3, kind: input, shape index: {}]   ;;  %s974_s4 = inlined_call_operand.vmem [shape: f32[32,1], index: 4, kind: input, shape index: {}]   ;;  %s975_s5 = inlined_call_operand.vmem [shape: f32[32,1], index: 5, kind: input, shape index: {}]   ;;  %s976_s6 = inlined_call_operand.vmem [shape: f32[16,1], index: 6, kind: input, shape index: {}]   ;;  %s977_s7 = inlined_call_operand.vmem [shape: bf16[1,48], index: 7, kind: input, shape index: {}]   ;;  %s978_s8 = inlined_call_operand.<no memory space> [shape: f32[1,1], index: 8, kind: input, shape index: {}]   ;;  %s979_s9 = inlined_call_operand.hbm [shape: f32[1,1,2], index: 9, kind: output, shape index: {}]  }
   0x1   :  { %v14_v0 = vstv %s978_s8 }
   0x2   :  { %15 = vst [vmem:[#allocation5] sm:$0x1] %v14_v0 }
   0x3   :  { %v68_v1 = vld [vmem:[%s970_s0] sm:$0xff]  ;;  %v69_v2 = vld [vmem:[%s970_s0 + $0x8] sm:$0xff]  ;;  %v773_v5 = vmov 0   ;;  %v91_v7 = vld [vmem:[%s974_s4 + $0x10] sm:$0xff]  ;;  %vm44_vm0 = vcmask 257024  }
   0x4   :  { %v735_v3 = vld [vmem:[%s970_s0 + $0x3] ss:$0 sm:$0xff]  ;;  %v736_v4 = vld [vmem:[%s970_s0 + $0x2] ss:$0 sm:$0xff]  ;;  %732 = vset.pattern.permute.xlu0 %v773_v5  ;;  %734 = vset.pattern.permute.xlu2 %v773_v5  ;;  %v737_v6 = vld [vmem:[%s970_s0 + $0x1] ss:$0 sm:$0xff] }
   0x5   :  { %733 = vset.pattern.permute.xlu1 %v773_v5  ;;  %v71_v8 = vmul.f32 %v735_v3, %v68_v1  ;;  %v72_v9 = vmul.f32 %v735_v3, %v69_v2  ;;  %v61_v10 = vmul.f32 %v736_v4, %v68_v1  ;;  %v62_v11 = vmul.f32 %v736_v4, %v69_v2  ;;  %v738_v12 = vld [vmem:[%s970_s0] ss:$0 sm:$0xff]  ;;  %v92_v23 = vld [vmem:[%s974_s4 + $0x18] sm:$0xff] }
   0x6   :  { %105 = vperm.xlu0 %732, %v91_v7   ;;  %v51_v13 = vmul.f32 %v737_v6, %v68_v1  ;;  %v52_v14 = vmul.f32 %v737_v6, %v69_v2  ;;  %v40_v19 = vmul.f32 %v738_v12, %v68_v1  ;;  %v41_v20 = vmul.f32 %v738_v12, %v69_v2 }
   0x7   :  { %v73_v15 = vpack.c.bf16 %v71_v8, %v71_v8  ;;  %v74_v16 = vpack.c.bf16 %v72_v9, %v72_v9  ;;  %v63_v17 = vpack.c.bf16 %v61_v10, %v61_v10  ;;  %v64_v18 = vpack.c.bf16 %v62_v11, %v62_v11 }
   0x8   :  { %v53_v21 = vpack.c.bf16 %v51_v13, %v51_v13  ;;  %v54_v22 = vpack.c.bf16 %v52_v14, %v52_v14 }
   0x9   :  { %75 = vst.msk [vmem:[#allocation2 + $0x18] sm:$0xf] %vm44_vm0, %v73_v15 }
   0xa   :  { %76 = vst.msk [vmem:[#allocation2 + $0x1c] sm:$0xf] %vm44_vm0, %v74_v16 }
   0xb   :  { %16 = vsyncpa [#allocation7], 0  ;;  %65 = vst.msk [vmem:[#allocation2 + $0x10] sm:$0xf] %vm44_vm0, %v63_v17  ;;  %v42_v24 = vpack.c.bf16 %v40_v19, %v40_v19  ;;  %v43_v25 = vpack.c.bf16 %v41_v20, %v41_v20  ;;  %v245_v27 = vld [vmem:[%s975_s5] sm:$0xff]  ;;  %v399_v31 = vld [vmem:[%s976_s6 + $0x8] sm:$0xff] }
   0xc   :  { %66 = vst.msk [vmem:[#allocation2 + $0x14] sm:$0xf] %vm44_vm0, %v64_v18  ;;  %v398_v28 = vld [vmem:[%s976_s6] sm:$0xff]  ;;  %v90_v32 = vld [vmem:[%s974_s4 + $0x8] sm:$0xff]  ;;  %vm147_vm1 = vcmask 523264   ;;  %v247_v15 = vld [vmem:[%s975_s5 + $0x10] sm:$0xff] }
   0xd   :  { %55 = vst.msk [vmem:[#allocation2 + $0x8] sm:$0xf] %vm44_vm0, %v53_v21  ;;  %402 = vperm.xlu2 %734, %v398_v28   ;;  %v677_v34 = vld [vmem:[%s971_s1] sm:$0xff]  ;;  %v678_v36 = vld [vmem:[%s971_s1 + $0x8] sm:$0xff]  ;;  %261 = vperm.xlu1 %733, %v247_v15   ;;  %v248_v20 = vld [vmem:[%s975_s5 + $0x18] sm:$0xff]  ;;  %vm487_vm7 = vcmask 392192  }
   0xe   :  { %110 = vperm.xlu0 %732, %v92_v23   ;;  %56 = vst.msk [vmem:[#allocation2 + $0xc] sm:$0xf] %vm44_vm0, %v54_v22  ;;  %v89_v35 = vld [vmem:[%s974_s4] sm:$0xff]  ;;  %v246_v22 = vld [vmem:[%s975_s5 + $0x8] sm:$0xff]  ;;  %vm540_vm15 = vcmask 261120   ;;  %s573_s19 = sshll.u32 %s979_s9, 4  ;;  %s574_s19 = int_to_ptr.hbm [resolvable:$true] %s573_s19 }
   0xf   :  { %45 = vst.msk [vmem:[#allocation2] sm:$0xf] %vm44_vm0, %v42_v24  ;;  %v739_v60 = vld [vmem:[%s970_s0] ss:$0 sm:$0xff]  ;;  %v740_v61 = vld [vmem:[%s970_s0 + $0x1] ss:$0 sm:$0xff] }
  0x10   :  { %46 = vst.msk [vmem:[#allocation2 + $0x4] sm:$0xf] %vm44_vm0, %v43_v25  ;;  %v741_v63 = vld [vmem:[%s970_s0 + $0x2] ss:$0 sm:$0xff]  ;;  %v742_v2 = vld [vmem:[%s970_s0 + $0x3] ss:$0 sm:$0xff] }
  0x11   :  { %v682_v26 = vld [vmem:[#allocation2 + $0x18] sm:$0xff]  ;;  %v533_v24 = vld [vmem:[#allocation5] sm:$0x1]  ;;  %v684_v28 = vld [vmem:[%s972_s2 + $0x8] sm:$0xff] }
  0x12   :  { %158 = vmatpush.bf16.msra.mxu0 %v682_v26 }
  0x13   :  { %v681_v29 = vld [vmem:[#allocation2 + $0x10] sm:$0xff] }
  0x15   :  { %v680_v30 = vld [vmem:[#allocation2 + $0x8] sm:$0xff]  ;;  %407 = vperm.xlu2 %734, %v399_v31   ;;  %266 = vperm.xlu1 %733, %v248_v20  }
  0x16   :  { %251 = vperm.xlu0 %732, %v245_v27   ;;  %159 = vmatpush.bf16.msra.mxu0 %v681_v29  ;;  %v683_v27 = vld [vmem:[%s972_s2] sm:$0xff] }
  0x17   :  { %v679_v33 = vld [vmem:[#allocation2] sm:$0xff] }
  0x1a   :  { %160 = vmatpush.bf16.msra.mxu0 %v680_v30 }
  0x1d   :  { %95 = vperm.xlu2 %734, %v89_v35   ;;  %256 = vperm.xlu1 %733, %v246_v22  }
  0x1e   :  { %100 = vperm.xlu0 %732, %v90_v32   ;;  %161 = vmatpush.bf16.msra.mxu0 %v679_v33 }
  0x21   :  { %606 = vmatmul.msk.bf16.vlgmr.msra.gmra.mxu0 %vm147_vm1, %v677_v34 }
  0x25   :  { %536 = vperm.xlu1 %733, %v533_v24  }
  0x31   :  { %607 = vmatmul.msk.bf16.gmra.mxu0 %vm147_vm1, %v678_v36 }
  0x67   :  { %v884_v38 = vpop.permute.xlu2 %402 }
  0x6f   :  { %v886_v40 = vpop.permute.xlu2 %407 }
  0x77   :  { %v96_v42 = vpop.permute.xlu2 %95 }
  0x78   :  { %v106_v37 = vpop.permute.xlu0 %105 }
  0x7f   :  { %v262_v29 = vpop.permute.xlu1 %261 }
  0x80   :  { %v111_v39 = vpop.permute.xlu0 %110 }
  0x87   :  { %v267_v30 = vpop.permute.xlu1 %266 }
  0x88   :  { %v888_v41 = vpop.permute.xlu0 %251 }
  0x8f   :  { %v257_v35 = vpop.permute.xlu1 %256 }
  0x90   :  { %v101_v47 = vpop.permute.xlu0 %100 }
  0x9e   :  { %v163_v43 = vpop.f32.mrf.mxu0 }
  0x9f   :  { %v164_v44 = vadd.f32 %v163_v43, %v96_v42 }
  0xa1   :  { %v173_v45 = vmax.f32 %v164_v44, 0.0 }
  0xa3   :  { %v177_v46 = vpack.c.bf16 %v173_v45, %v173_v45 }
  0xa5   :  { %179 = vst.msk [vmem:[#allocation4] sm:$0xf] %vm44_vm0, %v177_v46 }
  0xa6   :  { %v165_v48 = vpop.f32.mrf.mxu0 }
  0xa7   :  { %v166_v49 = vadd.f32 %v165_v48, %v101_v47 }
  0xa9   :  { %v174_v50 = vmax.f32 %v166_v49, 0.0 }
  0xab   :  { %v178_v51 = vpack.c.bf16 %v174_v50, %v174_v50  ;;  %v743_v50 = vld [vmem:[%s970_s0 + $0x3] ss:$0 sm:$0xff] }
  0xad   :  { %180 = vst.msk [vmem:[#allocation4 + $0x4] sm:$0xf] %vm44_vm0, %v178_v51  ;;  %v744_v51 = vld [vmem:[%s970_s0 + $0x2] ss:$0 sm:$0xff] }
  0xae   :  { %v168_v52 = vpop.f32.mrf.mxu0 }
  0xaf   :  { %v169_v53 = vadd.f32 %v168_v52, %v106_v37 }
  0xb1   :  { %v175_v54 = vmax.f32 %v169_v53, 0.0  ;;  %v745_v53 = vld [vmem:[%s970_s0 + $0x1] ss:$0 sm:$0xff] }
  0xb3   :  { %v181_v55 = vpack.c.bf16 %v175_v54, %v175_v54 }
  0xb5   :  { %183 = vst.msk [vmem:[#allocation3] sm:$0xf] %vm44_vm0, %v181_v55 }
  0xb6   :  { %v170_v56 = vpop.f32.mrf.mxu0 }
  0xb7   :  { %v171_v57 = vadd.f32 %v170_v56, %v111_v39  ;;  %v746_v56 = vld [vmem:[%s970_s0] ss:$0 sm:$0xff] }
  0xb9   :  { %v176_v58 = vmax.f32 %v171_v57, 0.0 }
  0xbb   :  { %v182_v59 = vpack.c.bf16 %v176_v58, %v176_v58 }
  0xbd   :  { %184 = vst.msk [vmem:[#allocation3 + $0x4] sm:$0xf] %vm44_vm0, %v182_v59 }
  0xc4   :  { %v698_v62 = vld [vmem:[#allocation3] sm:$0xff]  }
  0xc5   :  { %v699_v0 = vunpack.c.l.bf16 %v698_v62  ;;  %v700_v1 = vunpack.c.h.bf16 %v698_v62 }
  0xc7   :  { %v191_v3 = vmul.f32 %v739_v60, %v699_v0  ;;  %v192_v4 = vmul.f32 %v739_v60, %v700_v1  ;;  %v203_v5 = vmul.f32 %v740_v61, %v699_v0  ;;  %v204_v6 = vmul.f32 %v740_v61, %v700_v1 }
  0xc8   :  { %v215_v7 = vmul.f32 %v741_v63, %v699_v0  ;;  %v216_v8 = vmul.f32 %v741_v63, %v700_v1  ;;  %v227_v12 = vmul.f32 %v742_v2, %v699_v0  ;;  %v228_v14 = vmul.f32 %v742_v2, %v700_v1 }
  0xc9   :  { %v193_v9 = vpack.c.bf16 %v191_v3, %v191_v3  ;;  %v194_v10 = vpack.c.bf16 %v192_v4, %v192_v4  ;;  %v205_v11 = vpack.c.bf16 %v203_v5, %v203_v5  ;;  %v206_v13 = vpack.c.bf16 %v204_v6, %v204_v6 }
  0xca   :  { %v217_v16 = vpack.c.bf16 %v215_v7, %v215_v7  ;;  %v218_v17 = vpack.c.bf16 %v216_v8, %v216_v8  ;;  %v229_v18 = vpack.c.bf16 %v227_v12, %v227_v12  ;;  %v230_v19 = vpack.c.bf16 %v228_v14, %v228_v14 }
  0xcb   :  { %195 = vst.msk [vmem:[#allocation2] sm:$0xf] %vm44_vm0, %v193_v9 }
  0xcc   :  { %196 = vst.msk [vmem:[#allocation2 + $0x4] sm:$0xf] %vm44_vm0, %v194_v10 }
  0xcd   :  { %207 = vst.msk [vmem:[#allocation2 + $0x8] sm:$0xf] %vm44_vm0, %v205_v11 }
  0xce   :  { %208 = vst.msk [vmem:[#allocation2 + $0xc] sm:$0xf] %vm44_vm0, %v206_v13  ;;  %v689_v13 = vld [vmem:[%s973_s3] sm:$0xff] }
  0xcf   :  { %219 = vst.msk [vmem:[#allocation2 + $0x10] sm:$0xf] %vm44_vm0, %v217_v16 }
  0xd0   :  { %220 = vst.msk [vmem:[#allocation2 + $0x14] sm:$0xf] %vm44_vm0, %v218_v17 }
  0xd1   :  { %231 = vst.msk [vmem:[#allocation2 + $0x18] sm:$0xf] %vm44_vm0, %v229_v18 }
  0xd2   :  { %232 = vst.msk [vmem:[#allocation2 + $0x1c] sm:$0xf] %vm44_vm0, %v230_v19 }
  0xd3   :  { %v685_v26 = vld [vmem:[#allocation2] sm:$0xff] }
  0xd5   :  { %v686_v25 = vld [vmem:[#allocation2 + $0x8] sm:$0xff] }
  0xd7   :  { %v687_v23 = vld [vmem:[#allocation2 + $0x10] sm:$0xff] }
  0xd9   :  { %v688_v21 = vld [vmem:[#allocation2 + $0x18] sm:$0xff] }
  0xda   :  { %313 = vmatpush.bf16.msra.mxu1 %v688_v21  ;;  %v504_v21 = vlaneseq }
  0xdc   :  { %v505_v24 = vshrl.u32 %v504_v21, 7 }
  0xde   :  { %314 = vmatpush.bf16.msra.mxu1 %v687_v23  ;;  %v510_v23 = vand.u32 127, %v504_v21 }
  0xe2   :  { %315 = vmatpush.bf16.msra.mxu1 %v686_v25  ;;  %v511_v25 = vmul.u32 16, %v510_v23 }
  0xe4   :  { %vm512_vm11 = vcmp.ge.s32.totalorder %v505_v24, %v511_v25 }
  0xe6   :  { %316 = vmatpush.bf16.msra.mxu1 %v685_v26 }
  0xe9   :  { %632 = vmatmul.msk.bf16.vlgmr.msra.gmra.mxu1 %vm147_vm1, %v683_v27  ;;  %v508_v27 = vadd.s32 24, %v505_v24 }
  0xeb   :  { %vm515_vm2 = vcmp.ge.s32.totalorder %v508_v27, %v511_v25 }
  0xf9   :  { %633 = vmatmul.msk.bf16.gmra.mxu1 %vm147_vm1, %v684_v28  ;;  %v516_v28 = vadd.s32 16, %v511_v25 }
  0xfb   :  { %vm520_vm3 = vcmp.lt.s32.totalorder %v508_v27, %v516_v28  ;;  %vm517_vm12 = vcmp.lt.s32.totalorder %v505_v24, %v516_v28 }
  0xfc   :  { %vm524_vm4 = vmand %vm515_vm2, %vm520_vm3 }
  0xfd   :  { %vm521_vm14 = vmand %vm512_vm11, %vm517_vm12 }
 0x166   :  { %v318_v31 = vpop.f32.mrf.mxu1 }
 0x167   :  { %v319_v32 = vadd.f32 %v318_v31, %v888_v41  ;;  %v694_v31 = vld [vmem:[#allocation4] sm:$0xff] }
 0x169   :  { %v328_v33 = vmax.f32 %v319_v32, 0.0  ;;  %v774_v32 = vmov 1.0  }
 0x16b   :  { %v332_v34 = vpack.c.bf16 %v328_v33, %v328_v33 }
 0x16d   :  { %334 = vst.msk [vmem:[#allocation4 + $0x8] sm:$0xf] %vm44_vm0, %v332_v34 }
 0x16e   :  { %v320_v36 = vpop.f32.mrf.mxu1 }
 0x16f   :  { %v321_v37 = vadd.f32 %v320_v36, %v257_v35  ;;  %v537_v35 = vpop.permute.xlu1 %536 }
 0x170   :  { %v539_v36 = vperm.slane %v537_v35, 0 }
 0x171   :  { %v329_v39 = vmax.f32 %v321_v37, 0.0 }
 0x173   :  { %v333_v42 = vpack.c.bf16 %v329_v39, %v329_v39 }
 0x175   :  { %335 = vst.msk [vmem:[#allocation4 + $0xc] sm:$0xf] %vm44_vm0, %v333_v42 }
 0x176   :  { %v323_v43 = vpop.f32.mrf.mxu1 }
 0x177   :  { %v324_v44 = vadd.f32 %v323_v43, %v262_v29  ;;  %v507_v29 = vadd.s32 16, %v505_v24 }
 0x179   :  { %v330_v45 = vmax.f32 %v324_v44, 0.0  ;;  %vm514_vm5 = vcmp.ge.s32.totalorder %v507_v29, %v511_v25  ;;  %vm519_vm6 = vcmp.lt.s32.totalorder %v507_v29, %v516_v28 }
 0x17a   :  { %vm523_vm10 = vmand %vm514_vm5, %vm519_vm6 }
 0x17b   :  { %v336_v46 = vpack.c.bf16 %v330_v45, %v330_v45 }
 0x17d   :  { %338 = vst.msk [vmem:[#allocation3] sm:$0xf] %vm44_vm0, %v336_v46 }
 0x17e   :  { %v325_v47 = vpop.f32.mrf.mxu1 }
 0x17f   :  { %v326_v48 = vadd.f32 %v325_v47, %v267_v30  ;;  %v506_v30 = vadd.s32 8, %v505_v24 }
 0x181   :  { %v331_v41 = vmax.f32 %v326_v48, 0.0  ;;  %vm513_vm8 = vcmp.ge.s32.totalorder %v506_v30, %v511_v25  ;;  %vm518_vm9 = vcmp.lt.s32.totalorder %v506_v30, %v516_v28 }
 0x182   :  { %vm522_vm13 = vmand %vm513_vm8, %vm518_vm9 }
 0x183   :  { %v337_v49 = vpack.c.bf16 %v331_v41, %v331_v41 }
 0x185   :  { %339 = vst.msk [vmem:[#allocation3 + $0x4] sm:$0xf] %vm44_vm0, %v337_v49 }
 0x18c   :  { %v726_v52 = vld [vmem:[#allocation3] sm:$0xff]  }
 0x18d   :  { %v727_v54 = vunpack.c.l.bf16 %v726_v52  ;;  %v728_v55 = vunpack.c.h.bf16 %v726_v52 }
 0x18f   :  { %v382_v57 = vmul.f32 %v743_v50, %v727_v54  ;;  %v383_v58 = vmul.f32 %v743_v50, %v728_v55  ;;  %v370_v59 = vmul.f32 %v744_v51, %v727_v54  ;;  %v371_v60 = vmul.f32 %v744_v51, %v728_v55 }
 0x190   :  { %v358_v61 = vmul.f32 %v745_v53, %v727_v54  ;;  %v359_v62 = vmul.f32 %v745_v53, %v728_v55  ;;  %v346_v2 = vmul.f32 %v746_v56, %v727_v54  ;;  %v347_v4 = vmul.f32 %v746_v56, %v728_v55 }
 0x191   :  { %v384_v63 = vpack.c.bf16 %v382_v57, %v382_v57  ;;  %v385_v0 = vpack.c.bf16 %v383_v58, %v383_v58  ;;  %v372_v1 = vpack.c.bf16 %v370_v59, %v370_v59  ;;  %v373_v3 = vpack.c.bf16 %v371_v60, %v371_v60 }
 0x192   :  { %v360_v5 = vpack.c.bf16 %v358_v61, %v358_v61  ;;  %v361_v6 = vpack.c.bf16 %v359_v62, %v359_v62  ;;  %v348_v7 = vpack.c.bf16 %v346_v2, %v346_v2  ;;  %v349_v8 = vpack.c.bf16 %v347_v4, %v347_v4 }
 0x193   :  { %386 = vst.msk [vmem:[#allocation2 + $0x18] sm:$0xf] %vm44_vm0, %v384_v63 }
 0x194   :  { %387 = vst.msk [vmem:[#allocation2 + $0x1c] sm:$0xf] %vm44_vm0, %v385_v0 }
 0x195   :  { %374 = vst.msk [vmem:[#allocation2 + $0x10] sm:$0xf] %vm44_vm0, %v372_v1 }
 0x196   :  { %375 = vst.msk [vmem:[#allocation2 + $0x14] sm:$0xf] %vm44_vm0, %v373_v3 }
 0x197   :  { %362 = vst.msk [vmem:[#allocation2 + $0x8] sm:$0xf] %vm44_vm0, %v360_v5 }
 0x198   :  { %363 = vst.msk [vmem:[#allocation2 + $0xc] sm:$0xf] %vm44_vm0, %v361_v6 }
 0x199   :  { %350 = vst.msk [vmem:[#allocation2] sm:$0xf] %vm44_vm0, %v348_v7 }
 0x19a   :  { %351 = vst.msk [vmem:[#allocation2 + $0x4] sm:$0xf] %vm44_vm0, %v349_v8 }
 0x19b   :  { %v693_v9 = vld [vmem:[#allocation2 + $0x18] sm:$0xff] }
 0x19c   :  { %446 = vmatpush.bf16.msra.mxu2 %v693_v9 }
 0x19d   :  { %v692_v10 = vld [vmem:[#allocation2 + $0x10] sm:$0xff] }
 0x19f   :  { %v691_v11 = vld [vmem:[#allocation2 + $0x8] sm:$0xff] }
 0x1a0   :  { %447 = vmatpush.bf16.msra.mxu2 %v692_v10 }
 0x1a1   :  { %v690_v12 = vld [vmem:[#allocation2] sm:$0xff] }
 0x1a4   :  { %448 = vmatpush.bf16.msra.mxu2 %v691_v11 }
 0x1a8   :  { %449 = vmatpush.bf16.msra.mxu2 %v690_v12 }
 0x1ab   :  { %654 = vmatmul.msk.bf16.vlgmr.msra.gmra.mxu2 %vm147_vm1, %v689_v13 }
 0x22e   :  { %v451_v14 = vpop.f32.mrf.mxu2 }
 0x22f   :  { %v452_v15 = vadd.f32 %v451_v14, %v884_v38  ;;  %v695_v38 = vld [vmem:[#allocation4 + $0x8] sm:$0xff] }
 0x231   :  { %v456_v16 = vmax.f32 %v452_v15, 0.0 }
 0x233   :  { %v458_v17 = vpack.c.bf16 %v456_v16, %v456_v16 }
 0x235   :  { %460 = vst.msk [vmem:[#allocation4 + $0x10] sm:$0xf] %vm44_vm0, %v458_v17 }
 0x236   :  { %v453_v18 = vpop.f32.mrf.mxu2 }
 0x237   :  { %v454_v19 = vadd.f32 %v453_v18, %v886_v40  ;;  %v462_v40 = vld [vmem:[%s977_s7] sm:$0x1]  ;;  %s775_s7 = smov [#allocation6]  }
 0x238   :  { %s571_s4 = sshll.u32 %s775_s7, 4  ;;  %s572_s4 = int_to_ptr.vmem [resolvable:$true] %s571_s4 }
 0x239   :  { %v457_v20 = vmax.f32 %v454_v19, 0.0 }
 0x23b   :  { %v459_v22 = vpack.c.bf16 %v457_v20, %v457_v20 }
 0x23d   :  { %461 = vst.msk [vmem:[#allocation4 + $0x14] sm:$0xf] %vm44_vm0, %v459_v22  ;;  %vm564_vm0 = vcmask 8192  }
 0x244   :  { %v696_v26 = vld [vmem:[#allocation4 + $0x10] sm:$0xff] }
 0x245   :  { %496 = vmatpush.bf16.msra.mxu3 %v696_v26 }
 0x249   :  { %497 = vmatpush.bf16.msra.mxu3 %v695_v38 }
 0x24d   :  { %498 = vmatpush.bf16.msra.mxu3 %v694_v31 }
 0x250   :  { %667 = vmatmul.msk.bf16.vlgmr.msra.gmra.mxu3 %vm487_vm7, %v462_v40 }
 0x251   :  { %672 = vmatpush.msk.msrb.mxu3 %vm524_vm4, %v774_v32 }
 0x253   :  { %673 = vmatpush.msk.msrb.mxu3 %vm523_vm10, %v774_v32 }
 0x255   :  { %674 = vmatpush.msk.msrb.mxu3 %vm522_vm13, %v774_v32 }
 0x257   :  { %675 = vmatpush.msk.msrb.mxu3 %vm521_vm14, %v774_v32 }
 0x2d3   :  { %v500_v33 = vpop.f32.mrf.mxu3 }
 0x2d4   :  { %676 = vmatmul.msk.f32.vlgmr.msrb.gmra.mxu3 %vm540_vm15, %v500_v33 }
 0x2db   :  { %v502_v34 = vpop.f32.mrf.mxu3 }
 0x357   :  { %v561_v37 = vpop.f32.mrf.mxu3 }
 0x358   :  { %v562_v39 = vadd.f32 %v561_v37, %v539_v36 }
 0x35a   :  { %565 = vst.msk [vmem:[#allocation6] sm:$0x1] %vm564_vm0, %v562_v39 }
 0x35b   :  { %576 = dma.vmem_to_hbm [thread:$0]  %s572_s4, 16, %s574_s19, [#allocation7]  }
 0x35c   :  { %771 = dma.done.wait [#allocation7], 16  }
 0x35d   :  { %772 = vsyncadd [#allocation7], 4294967280 }
 0x35e   :  { %581 = vsyncpa [#allocation7], 1 }

</bundles_post_ra>
